<compile_context>
chip_gen: v6e
topology: v6e:2x2x1
jax: 0.10.0
libtpu: 0.0.40
codegen_flags: <defaults>
</compile_context>

<pallas_src>
import jax
import jax.numpy as jnp
from jax import lax
from jax.experimental import pallas as pl
from jax.experimental.pallas import tpu as pltpu

# "option" hyper-parameters (synthetic, small).  input_size must equal embedding_size
# because the same LSTM consumes both image features and word embeddings.
INPUT_SIZE = 32       # option.input_size == option.embedding_size
HIDDEN_SIZE = 32      # option.hidden_size
N_WORDS = 128         # option.n_words
NUM_LAYERS = 1        # option.num_layers (dropout between layers is a no-op for 1 layer)
BATCH = 8             # option.batch_size
MAX_LEN = 17
NUM_STEPS = MAX_LEN + 1   # 1 image-feature step + 17 caption steps

# Packed-parameter row offsets (every segment starts on an 8-sublane boundary).
_R_WIH = 0                          # (D, 4H)   g-columns pre-scaled by 2
_R_WHH = _R_WIH + INPUT_SIZE        # (H, 4H)   g-columns pre-scaled by 2
_R_WFC = _R_WHH + HIDDEN_SIZE       # (H, V)
_R_B   = _R_WFC + HIDDEN_SIZE       # (8, 4H)   LSTM bias replicated over 8 rows, g x2
_R_BFC = _R_B + 8                   # (8, V)    fc bias replicated (only row 0 is read)
_R_EMB = _R_BFC + 8                 # (V, 4H)   embed @ W_ih^T + b, g-columns x2
_R_TOT = _R_EMB + N_WORDS           # 240 rows x 128 lanes = 120 KB f32


# ----------------------------- Pallas kernel ---------------------------------------
def _caption_lstm_kernel(img_ref, idx_ref, w_ref, logits_ref, gx_sc, h_all_sc):
    """Single grid-less invocation: fused embedding, 18-step LSTM recurrence, batched fc.

    img_ref:    (B, D)        image features (LSTM step 0)
    idx_ref:    (NUM_STEPS*B, 1) int32: rows 0:136 = time-major token ids,
                                  rows 136:144 = sorted caption lengths
    w_ref:      (240, 128)    packed parameters (see _R_* offsets)
    logits_ref: (MAX_LEN*B, V)
    gx_sc:      (NUM_STEPS*B, 4H) VMEM scratch: hoisted per-step input projections
    h_all_sc:   (MAX_LEN*B, H)    VMEM scratch: masked per-step hidden states
    """
    B, H, D, V = BATCH, HIDDEN_SIZE, INPUT_SIZE, N_WORDS

    # ---- hoisted input projection for all 18 steps (2 MXU matmuls, off the chain) ----
    # step 0: image features  ->  img @ W_ih^T + b   (g-columns already pre-scaled x2)
    gx_sc[0:B, :] = (
        jnp.dot(img_ref[...], w_ref[_R_WIH:_R_WIH + D, :],
                preferred_element_type=jnp.float32)
        + w_ref[_R_B:_R_B + B, :])
    # steps 1..17: fused embedding-gather + input projection + bias via ONE one-hot MXU
    # matmul against the host-prefolded (embed @ W_ih^T + b) table.
    ids = idx_ref[0:MAX_LEN * B, :]                                   # (136, 1) int32
    vocab = lax.broadcasted_iota(jnp.int32, (MAX_LEN * B, V), 1)      # (136, 128)
    onehot = (vocab == ids).astype(jnp.float32)                       # (136, 128)
    gx_sc[B:NUM_STEPS * B, :] = jnp.dot(
        onehot, w_ref[_R_EMB:_R_EMB + V, :], preferred_element_type=jnp.float32)

    # sorted caption lengths for the pack/pad validity mask
    len_col = idx_ref[MAX_LEN * B:MAX_LEN * B + B, :]                 # (B, 1) int32

    w_hh = w_ref[_R_WHH:_R_WHH + H, :]                                # (32, 128) in vregs

    h = jnp.zeros((B, H), jnp.float32)
    c = jnp.zeros((B, H), jnp.float32)

    # Statically unrolled serial recurrence (18 steps, tiny body).  The only work on the
    # serial chain is one (8,32)@(32,128) matmul, one full-width sigmoid, one small
    # tanh(c), and a few (8,32) VPU ops.
    for t in range(NUM_STEPS):
        gates = gx_sc[t * B:(t + 1) * B, :] + jnp.dot(
            h, w_hh, preferred_element_type=jnp.float32)              # (8, 128)

        # One full-lane-width EUP push.  PyTorch gate order: i, f, g, o.
        # g-gate pre-activations were scaled by 2 host-side, so tanh(x) = 2*sigmoid(2x)-1.
        sig = jax.nn.sigmoid(gates)
        i_g = sig[:, 0 * H:1 * H]
        f_g = sig[:, 1 * H:2 * H]
        g_g = 2.0 * sig[:, 2 * H:3 * H] - 1.0
        o_g = sig[:, 3 * H:4 * H]

        c = f_g * c + i_g * g_g
        h = o_g * jnp.tanh(c)                                         # small (8,32) EUP

        if t >= 1:                                                    # caption steps only
            # pack/pad_packed: zero the output at padded timesteps (store-side mask,
            # off the recurrence chain).
            m = (len_col > (t - 1)).astype(jnp.float32)               # (B, 1)
            h_all_sc[(t - 1) * B:t * B, :] = h * m

    # One batched fc matmul + lane-dense (136,128) store for all 17 caption steps.
    logits_ref[...] = (
        jnp.dot(h_all_sc[...], w_ref[_R_WFC:_R_WFC + H, :],
                preferred_element_type=jnp.float32)
        + w_ref[_R_BFC:_R_BFC + 1, :])


def lstm_caption_pallas(img, idx_pack, w_pack):
    vmem = pl.BlockSpec(memory_space=pltpu.MemorySpace.VMEM)
    return pl.pallas_call(
        _caption_lstm_kernel,
        out_shape=jax.ShapeDtypeStruct((MAX_LEN * BATCH, N_WORDS), jnp.float32),
        in_specs=[vmem, vmem, vmem],            # 3 inputs, all fully resident in VMEM
        out_specs=vmem,
        scratch_shapes=[
            pltpu.VMEM((NUM_STEPS * BATCH, 4 * HIDDEN_SIZE), jnp.float32),
            pltpu.VMEM((MAX_LEN * BATCH, HIDDEN_SIZE), jnp.float32),
        ],
    )(img, idx_pack, w_pack)


# ------------------------------- host-side glue --------------------------------------
def pack_kernel_params(params):
    """Pack all 128-lane-wide parameters into one (240,128) f32 array (done once).

    Also pre-folds embedding + input projection + bias (inference-time weight folding),
    and pre-scales the g-gate columns by 2 so the kernel needs only one sigmoid per step.
    """
    H, D, V = HIDDEN_SIZE, INPUT_SIZE, N_WORDS
    assert 4 * H == 128 and V == 128 and BATCH <= 8
    scale = jnp.ones((1, 4 * H), jnp.float32).at[:, 2 * H:3 * H].set(2.0)

    w_ih_s = params["W_ih_t"] * scale                                  # (D, 4H)
    w_hh_s = params["W_hh_t"] * scale                                  # (H, 4H)
    b_s = jnp.tile(params["b"] * scale, (8, 1))                        # (8, 4H)
    b_fc = jnp.tile(params["b_fc"], (8, 1))                            # (8, V)
    emb_proj_s = (params["embed"] @ params["W_ih_t"] + params["b"]) * scale   # (V, 4H)

    w_pack = jnp.concatenate(
        [w_ih_s, w_hh_s, params["W_fc_t"], b_s, b_fc, emb_proj_s], axis=0)
    assert w_pack.shape == (_R_TOT, 128)
    return w_pack


def captioning_forward(w_pack, image_features, tokens, lengths):
    # torch: seq_len.sort(0, descending=True); output stays in sorted order.
    # TODO(synk): jnp.argsort is stable while torch.sort is not guaranteed stable, so row
    # ordering may differ from PyTorch for tied lengths (values still correct).
    perm = jnp.argsort(-lengths)
    lengths_s = lengths[perm].astype(jnp.int32)                        # (B,)
    tokens_s = tokens[perm].astype(jnp.int32)                          # (B, 17)
    ids_tm = tokens_s.T.reshape(MAX_LEN * BATCH, 1)                    # time-major (136,1)
    idx_pack = jnp.concatenate(
        [ids_tm, lengths_s.reshape(BATCH, 1)], axis=0)                 # (144, 1) int32
    img = image_features.reshape(BATCH, INPUT_SIZE)                    # (B, D)

    logits_flat = lstm_caption_pallas(img, idx_pack, w_pack)           # (136, 128)
    return logits_flat.reshape(MAX_LEN, BATCH, N_WORDS)                # (17, B, n_words)


# ------------------------------ pure-JAX reference ----------------------------------
def captioning_reference(params, image_features, tokens, lengths):
    B = tokens.shape[0]
    H = HIDDEN_SIZE
    perm = jnp.argsort(-lengths)
    lengths_s = lengths[perm]
    tokens_s = tokens[perm]                                            # (B, 17)
    seq = tokens_s.T                                                   # (17, B)
    emb = params["embed"][seq]                                         # (17, B, D)
    xs = jnp.concatenate([image_features, emb], axis=0)                # (18, B, D)

    t_ids = jnp.arange(MAX_LEN, dtype=lengths.dtype)[:, None]
    valid = (t_ids < lengths_s[None, :]).astype(jnp.float32)           # (17, B)
    mask = jnp.concatenate([jnp.zeros((1, B), jnp.float32), valid], axis=0)[..., None]

    W_ih_t, W_hh_t, b = params["W_ih_t"], params["W_hh_t"], params["b"]
    W_fc_t, b_fc = params["W_fc_t"], params["b_fc"]

    def step(carry, xm):
        h, c = carry
        x, m = xm
        gates = x @ W_ih_t + h @ W_hh_t + b
        i_g = jax.nn.sigmoid(gates[:, 0 * H:1 * H])
        f_g = jax.nn.sigmoid(gates[:, 1 * H:2 * H])
        g_g = jnp.tanh(gates[:, 2 * H:3 * H])
        o_g = jax.nn.sigmoid(gates[:, 3 * H:4 * H])
        c_new = f_g * c + i_g * g_g
        h_new = o_g * jnp.tanh(c_new)
        out = (h_new * m) @ W_fc_t + b_fc
        return (h_new, c_new), out

    init = (jnp.zeros((B, H), jnp.float32), jnp.zeros((B, H), jnp.float32))
    _, outs = lax.scan(step, init, (xs, mask))
    return outs[1:]


# ----------------------------------- params -----------------------------------------
def init_params(key):
    ks = jax.random.split(key, 6)
    H, D, V = HIDDEN_SIZE, INPUT_SIZE, N_WORDS
    stdv = 1.0 / jnp.sqrt(H)                         # PyTorch LSTM default init
    W_ih = jax.random.uniform(ks[0], (4 * H, D), jnp.float32, -stdv, stdv)
    W_hh = jax.random.uniform(ks[1], (4 * H, H), jnp.float32, -stdv, stdv)
    b_ih = jax.random.uniform(ks[2], (4 * H,), jnp.float32, -stdv, stdv)
    b_hh = jax.random.uniform(ks[3], (4 * H,), jnp.float32, -stdv, stdv)
    embed = jax.random.normal(ks[4], (V, D), jnp.float32)           # nn.Embedding default
    bound = jnp.sqrt(6.0 / (H + V))                                 # xavier_uniform
    W_fc = jax.random.uniform(ks[5], (V, H), jnp.float32, -bound, bound)
    b_fc = jnp.zeros((V,), jnp.float32)                             # init.constant(0)
    return {
        "W_ih_t": W_ih.T,                            # (D, 4H)
        "W_hh_t": W_hh.T,                            # (H, 4H)
        "b": (b_ih + b_hh).reshape(1, 4 * H),        # (1, 4H)
        "embed": embed,                              # (V, D)
        "W_fc_t": W_fc.T,                            # (H, V)
        "b_fc": b_fc.reshape(1, V),                  # (1, V)
    }


# ------------------------------------ main -------------------------------------------
if __name__ == "__main__":
    key = jax.random.PRNGKey(0)
    k_param, k_feat, k_tok, k_len = jax.random.split(key, 4)

    params = init_params(k_param)
    w_pack = pack_kernel_params(params)              # parameter packing, done once

    # image features: length-1 sequence (as in the module's prediction path)
    image_features = jax.random.normal(k_feat, (1, BATCH, INPUT_SIZE), jnp.float32)
    # ragged captions, padded with 0 beyond each length (matches the torch zero-fill)
    lengths = jax.random.randint(k_len, (BATCH,), 3, MAX_LEN + 1).astype(jnp.int32)
    tokens = jax.random.randint(k_tok, (BATCH, MAX_LEN), 0, N_WORDS).astype(jnp.int32)
    tokens = jnp.where(jnp.arange(MAX_LEN)[None, :] < lengths[:, None], tokens, 0)

    fwd = jax.jit(captioning_forward)
    logits = fwd(w_pack, image_features, tokens, lengths)
    logits = jax.block_until_ready(logits)

    ref = captioning_reference(params, image_features, tokens, lengths)
    assert logits.shape == (MAX_LEN, BATCH, N_WORDS), logits.shape
    err = float(jnp.max(jnp.abs(logits - ref)))
    # Tolerance relaxed to 5e-4 per review: MXU f32 pass decomposition differs across
    # TPU generations and the kernel uses the exact tanh(x)=2*sigmoid(2x)-1 identity.
    assert err < 5e-4, f"mismatch vs reference: max abs err {err}"

    # TODO(synk): nn.LSTM dropout=0.7 only applies between stacked layers; with
    # num_layers=1 it is a no-op, so it is intentionally not modeled.
    print("KERNEL_OK")
</pallas_src>

<mosaic_0001>
module attributes {stable_mosaic.version = 11 : i64} {
  func.func @_caption_lstm_kernel(%arg0: memref<8x32xf32, #tpu.memory_space<vmem>>, %arg1: memref<144x1xi32, #tpu.memory_space<vmem>>, %arg2: memref<240x128xf32, #tpu.memory_space<vmem>>, %arg3: memref<136x128xf32, #tpu.memory_space<vmem>>, %arg4: memref<144x128xf32, #tpu.memory_space<vmem>>, %arg5: memref<136x32xf32, #tpu.memory_space<vmem>>) attributes {dimension_semantics = [], scalar_prefetch = 0 : i64, scratch_operands = 2 : i64, tpu.core_type = #tpu.core_type<tc>} {
    %c0 = arith.constant 0 : index
    %c0_0 = arith.constant 0 : index
    %0 = vector.load %arg0[%c0, %c0_0] : memref<8x32xf32, #tpu.memory_space<vmem>>, vector<8x32xf32>
    %c0_1 = arith.constant 0 : index
    %c0_2 = arith.constant 0 : index
    %1 = vector.load %arg2[%c0_1, %c0_2] : memref<240x128xf32, #tpu.memory_space<vmem>>, vector<32x128xf32>
    %cst = arith.constant dense<0.000000e+00> : vector<8x128xf32>
    %2 = tpu.matmul %0, %1, %cst {dimension_numbers = #tpu.dot_dimension_numbers<[1], [0], [0], [1], [0, 0, 1, 1], [], []>} : vector<8x32xf32>, vector<32x128xf32>, vector<8x128xf32> -> vector<8x128xf32>
    %c96 = arith.constant 96 : index
    %c0_3 = arith.constant 0 : index
    %3 = vector.load %arg2[%c96, %c0_3] : memref<240x128xf32, #tpu.memory_space<vmem>>, vector<8x128xf32>
    %4 = arith.addf %2, %3 : vector<8x128xf32>
    %c0_4 = arith.constant 0 : index
    %c0_5 = arith.constant 0 : index
    %5 = vector.load %arg4[%c0_4, %c0_5] : memref<144x128xf32, #tpu.memory_space<vmem>>, vector<8x128xf32>
    tpu.vector_store %arg4[%c0_4, %c0_5], %4 {strides = array<i32>} : memref<144x128xf32, #tpu.memory_space<vmem>>, vector<8x128xf32>,
    %c0_6 = arith.constant 0 : index
    %c0_7 = arith.constant 0 : index
    %6 = vector.load %arg1[%c0_6, %c0_7] : memref<144x1xi32, #tpu.memory_space<vmem>>, vector<136x1xi32>
    %7 = tpu.iota {dimensions = array<i32: 1>} : vector<136x128xi32>
    %8 = vector.broadcast %6 : vector<136x1xi32> to vector<136x128xi32>
    %9 = arith.cmpi eq, %7, %8 : vector<136x128xi32>
    %10 = arith.extui %9 : vector<136x128xi1> to vector<136x128xi32>
    %11 = arith.sitofp %10 : vector<136x128xi32> to vector<136x128xf32>
    %c112 = arith.constant 112 : index
    %c0_8 = arith.constant 0 : index
    %12 = vector.load %arg2[%c112, %c0_8] : memref<240x128xf32, #tpu.memory_space<vmem>>, vector<128x128xf32>
    %cst_9 = arith.constant dense<0.000000e+00> : vector<136x128xf32>
    %13 = tpu.matmul %11, %12, %cst_9 {dimension_numbers = #tpu.dot_dimension_numbers<[1], [0], [0], [1], [0, 0, 1, 1], [], []>} : vector<136x128xf32>, vector<128x128xf32>, vector<136x128xf32> -> vector<136x128xf32>
    %c8 = arith.constant 8 : index
    %c0_10 = arith.constant 0 : index
    %14 = vector.load %arg4[%c8, %c0_10] : memref<144x128xf32, #tpu.memory_space<vmem>>, vector<136x128xf32>
    tpu.vector_store %arg4[%c8, %c0_10], %13 {strides = array<i32>} : memref<144x128xf32, #tpu.memory_space<vmem>>, vector<136x128xf32>,
    %c136 = arith.constant 136 : index
    %c0_11 = arith.constant 0 : index
    %15 = vector.load %arg1[%c136, %c0_11] : memref<144x1xi32, #tpu.memory_space<vmem>>, vector<8x1xi32>
    %c32 = arith.constant 32 : index
    %c0_12 = arith.constant 0 : index
    %16 = vector.load %arg2[%c32, %c0_12] : memref<240x128xf32, #tpu.memory_space<vmem>>, vector<32x128xf32>
    %cst_13 = arith.constant 0.000000e+00 : f32
    %17 = vector.broadcast %cst_13 : f32 to vector<8x32xf32>
    %cst_14 = arith.constant 0.000000e+00 : f32
    %18 = vector.broadcast %cst_14 : f32 to vector<8x32xf32>
    %c0_15 = arith.constant 0 : index
    %c0_16 = arith.constant 0 : index
    %19 = vector.load %arg4[%c0_15, %c0_16] : memref<144x128xf32, #tpu.memory_space<vmem>>, vector<8x128xf32>
    %cst_17 = arith.constant dense<0.000000e+00> : vector<8x128xf32>
    %20 = tpu.matmul %17, %16, %cst_17 {dimension_numbers = #tpu.dot_dimension_numbers<[1], [0], [0], [1], [0, 0, 1, 1], [], []>} : vector<8x32xf32>, vector<32x128xf32>, vector<8x128xf32> -> vector<8x128xf32>
    %21 = arith.addf %19, %20 : vector<8x128xf32>
    %22 = arith.negf %21 : vector<8x128xf32>
    %23 = math.exp %22 : vector<8x128xf32>
    %cst_18 = arith.constant 1.000000e+00 : f32
    %24 = vector.broadcast %cst_18 : f32 to vector<8x128xf32>
    %25 = arith.addf %24, %23 : vector<8x128xf32>
    %26 = arith.divf %24, %25 : vector<8x128xf32>
    %27 = vector.extract_strided_slice %26 {offsets = [0, 0], sizes = [8, 32], strides = [1, 1]} : vector<8x128xf32> to vector<8x32xf32>
    %28 = vector.extract_strided_slice %26 {offsets = [0, 32], sizes = [8, 32], strides = [1, 1]} : vector<8x128xf32> to vector<8x32xf32>
    %29 = vector.extract_strided_slice %26 {offsets = [0, 64], sizes = [8, 32], strides = [1, 1]} : vector<8x128xf32> to vector<8x32xf32>
    %cst_19 = arith.constant 2.000000e+00 : f32
    %30 = vector.broadcast %cst_19 : f32 to vector<8x32xf32>
    %31 = arith.mulf %30, %29 : vector<8x32xf32>
    %cst_20 = arith.constant 1.000000e+00 : f32
    %32 = vector.broadcast %cst_20 : f32 to vector<8x32xf32>
    %33 = arith.subf %31, %32 : vector<8x32xf32>
    %34 = vector.extract_strided_slice %26 {offsets = [0, 96], sizes = [8, 32], strides = [1, 1]} : vector<8x128xf32> to vector<8x32xf32>
    %35 = arith.mulf %28, %18 : vector<8x32xf32>
    %36 = arith.mulf %27, %33 : vector<8x32xf32>
    %37 = arith.addf %35, %36 : vector<8x32xf32>
    %38 = math.tanh %37 : vector<8x32xf32>
    %39 = arith.mulf %34, %38 : vector<8x32xf32>
    %c8_21 = arith.constant 8 : index
    %c0_22 = arith.constant 0 : index
    %40 = vector.load %arg4[%c8_21, %c0_22] : memref<144x128xf32, #tpu.memory_space<vmem>>, vector<8x128xf32>
    %cst_23 = arith.constant dense<0.000000e+00> : vector<8x128xf32>
    %41 = tpu.matmul %39, %16, %cst_23 {dimension_numbers = #tpu.dot_dimension_numbers<[1], [0], [0], [1], [0, 0, 1, 1], [], []>} : vector<8x32xf32>, vector<32x128xf32>, vector<8x128xf32> -> vector<8x128xf32>
    %42 = arith.addf %40, %41 : vector<8x128xf32>
    %43 = arith.negf %42 : vector<8x128xf32>
    %44 = math.exp %43 : vector<8x128xf32>
    %cst_24 = arith.constant 1.000000e+00 : f32
    %45 = vector.broadcast %cst_24 : f32 to vector<8x128xf32>
    %46 = arith.addf %45, %44 : vector<8x128xf32>
    %47 = arith.divf %45, %46 : vector<8x128xf32>
    %48 = vector.extract_strided_slice %47 {offsets = [0, 0], sizes = [8, 32], strides = [1, 1]} : vector<8x128xf32> to vector<8x32xf32>
    %49 = vector.extract_strided_slice %47 {offsets = [0, 32], sizes = [8, 32], strides = [1, 1]} : vector<8x128xf32> to vector<8x32xf32>
    %50 = vector.extract_strided_slice %47 {offsets = [0, 64], sizes = [8, 32], strides = [1, 1]} : vector<8x128xf32> to vector<8x32xf32>
    %cst_25 = arith.constant 2.000000e+00 : f32
    %51 = vector.broadcast %cst_25 : f32 to vector<8x32xf32>
    %52 = arith.mulf %51, %50 : vector<8x32xf32>
    %cst_26 = arith.constant 1.000000e+00 : f32
    %53 = vector.broadcast %cst_26 : f32 to vector<8x32xf32>
    %54 = arith.subf %52, %53 : vector<8x32xf32>
    %55 = vector.extract_strided_slice %47 {offsets = [0, 96], sizes = [8, 32], strides = [1, 1]} : vector<8x128xf32> to vector<8x32xf32>
    %56 = arith.mulf %49, %37 : vector<8x32xf32>
    %57 = arith.mulf %48, %54 : vector<8x32xf32>
    %58 = arith.addf %56, %57 : vector<8x32xf32>
    %59 = math.tanh %58 : vector<8x32xf32>
    %60 = arith.mulf %55, %59 : vector<8x32xf32>
    %c0_i32 = arith.constant 0 : i32
    %61 = vector.broadcast %c0_i32 : i32 to vector<8x1xi32>
    %62 = arith.cmpi sgt, %15, %61 : vector<8x1xi32>
    %63 = arith.extui %62 : vector<8x1xi1> to vector<8x1xi32>
    %64 = arith.sitofp %63 : vector<8x1xi32> to vector<8x1xf32>
    %65 = vector.broadcast %64 : vector<8x1xf32> to vector<8x32xf32>
    %66 = arith.mulf %60, %65 : vector<8x32xf32>
    %c0_27 = arith.constant 0 : index
    %c0_28 = arith.constant 0 : index
    %67 = vector.load %arg5[%c0_27, %c0_28] : memref<136x32xf32, #tpu.memory_space<vmem>>, vector<8x32xf32>
    tpu.vector_store %arg5[%c0_27, %c0_28], %66 {strides = array<i32>} : memref<136x32xf32, #tpu.memory_space<vmem>>, vector<8x32xf32>,
    %c16 = arith.constant 16 : index
    %c0_29 = arith.constant 0 : index
    %68 = vector.load %arg4[%c16, %c0_29] : memref<144x128xf32, #tpu.memory_space<vmem>>, vector<8x128xf32>
    %cst_30 = arith.constant dense<0.000000e+00> : vector<8x128xf32>
    %69 = tpu.matmul %60, %16, %cst_30 {dimension_numbers = #tpu.dot_dimension_numbers<[1], [0], [0], [1], [0, 0, 1, 1], [], []>} : vector<8x32xf32>, vector<32x128xf32>, vector<8x128xf32> -> vector<8x128xf32>
    %70 = arith.addf %68, %69 : vector<8x128xf32>
    %71 = arith.negf %70 : vector<8x128xf32>
    %72 = math.exp %71 : vector<8x128xf32>
    %cst_31 = arith.constant 1.000000e+00 : f32
    %73 = vector.broadcast %cst_31 : f32 to vector<8x128xf32>
    %74 = arith.addf %73, %72 : vector<8x128xf32>
    %75 = arith.divf %73, %74 : vector<8x128xf32>
    %76 = vector.extract_strided_slice %75 {offsets = [0, 0], sizes = [8, 32], strides = [1, 1]} : vector<8x128xf32> to vector<8x32xf32>
    %77 = vector.extract_strided_slice %75 {offsets = [0, 32], sizes = [8, 32], strides = [1, 1]} : vector<8x128xf32> to vector<8x32xf32>
    %78 = vector.extract_strided_slice %75 {offsets = [0, 64], sizes = [8, 32], strides = [1, 1]} : vector<8x128xf32> to vector<8x32xf32>
    %cst_32 = arith.constant 2.000000e+00 : f32
    %79 = vector.broadcast %cst_32 : f32 to vector<8x32xf32>
    %80 = arith.mulf %79, %78 : vector<8x32xf32>
    %cst_33 = arith.constant 1.000000e+00 : f32
    %81 = vector.broadcast %cst_33 : f32 to vector<8x32xf32>
    %82 = arith.subf %80, %81 : vector<8x32xf32>
    %83 = vector.extract_strided_slice %75 {offsets = [0, 96], sizes = [8, 32], strides = [1, 1]} : vector<8x128xf32> to vector<8x32xf32>
    %84 = arith.mulf %77, %58 : vector<8x32xf32>
    %85 = arith.mulf %76, %82 : vector<8x32xf32>
    %86 = arith.addf %84, %85 : vector<8x32xf32>
    %87 = math.tanh %86 : vector<8x32xf32>
    %88 = arith.mulf %83, %87 : vector<8x32xf32>
    %c1_i32 = arith.constant 1 : i32
    %89 = vector.broadcast %c1_i32 : i32 to vector<8x1xi32>
    %90 = arith.cmpi sgt, %15, %89 : vector<8x1xi32>
    %91 = arith.extui %90 : vector<8x1xi1> to vector<8x1xi32>
    %92 = arith.sitofp %91 : vector<8x1xi32> to vector<8x1xf32>
    %93 = vector.broadcast %92 : vector<8x1xf32> to vector<8x32xf32>
    %94 = arith.mulf %88, %93 : vector<8x32xf32>
    %c8_34 = arith.constant 8 : index
    %c0_35 = arith.constant 0 : index
    %95 = vector.load %arg5[%c8_34, %c0_35] : memref<136x32xf32, #tpu.memory_space<vmem>>, vector<8x32xf32>
    tpu.vector_store %arg5[%c8_34, %c0_35], %94 {strides = array<i32>} : memref<136x32xf32, #tpu.memory_space<vmem>>, vector<8x32xf32>,
    %c24 = arith.constant 24 : index
    %c0_36 = arith.constant 0 : index
    %96 = vector.load %arg4[%c24, %c0_36] : memref<144x128xf32, #tpu.memory_space<vmem>>, vector<8x128xf32>
    %cst_37 = arith.constant dense<0.000000e+00> : vector<8x128xf32>
    %97 = tpu.matmul %88, %16, %cst_37 {dimension_numbers = #tpu.dot_dimension_numbers<[1], [0], [0], [1], [0, 0, 1, 1], [], []>} : vector<8x32xf32>, vector<32x128xf32>, vector<8x128xf32> -> vector<8x128xf32>
    %98 = arith.addf %96, %97 : vector<8x128xf32>
    %99 = arith.negf %98 : vector<8x128xf32>
    %100 = math.exp %99 : vector<8x128xf32>
    %cst_38 = arith.constant 1.000000e+00 : f32
    %101 = vector.broadcast %cst_38 : f32 to vector<8x128xf32>
    %102 = arith.addf %101, %100 : vector<8x128xf32>
    %103 = arith.divf %101, %102 : vector<8x128xf32>
    %104 = vector.extract_strided_slice %103 {offsets = [0, 0], sizes = [8, 32], strides = [1, 1]} : vector<8x128xf32> to vector<8x32xf32>
    %105 = vector.extract_strided_slice %103 {offsets = [0, 32], sizes = [8, 32], strides = [1, 1]} : vector<8x128xf32> to vector<8x32xf32>
    %106 = vector.extract_strided_slice %103 {offsets = [0, 64], sizes = [8, 32], strides = [1, 1]} : vector<8x128xf32> to vector<8x32xf32>
    %cst_39 = arith.constant 2.000000e+00 : f32
    %107 = vector.broadcast %cst_39 : f32 to vector<8x32xf32>
    %108 = arith.mulf %107, %106 : vector<8x32xf32>
    %cst_40 = arith.constant 1.000000e+00 : f32
    %109 = vector.broadcast %cst_40 : f32 to vector<8x32xf32>
    %110 = arith.subf %108, %109 : vector<8x32xf32>
    %111 = vector.extract_strided_slice %103 {offsets = [0, 96], sizes = [8, 32], strides = [1, 1]} : vector<8x128xf32> to vector<8x32xf32>
    %112 = arith.mulf %105, %86 : vector<8x32xf32>
    %113 = arith.mulf %104, %110 : vector<8x32xf32>
    %114 = arith.addf %112, %113 : vector<8x32xf32>
    %115 = math.tanh %114 : vector<8x32xf32>
    %116 = arith.mulf %111, %115 : vector<8x32xf32>
    %c2_i32 = arith.constant 2 : i32
    %117 = vector.broadcast %c2_i32 : i32 to vector<8x1xi32>
    %118 = arith.cmpi sgt, %15, %117 : vector<8x1xi32>
    %119 = arith.extui %118 : vector<8x1xi1> to vector<8x1xi32>
    %120 = arith.sitofp %119 : vector<8x1xi32> to vector<8x1xf32>
    %121 = vector.broadcast %120 : vector<8x1xf32> to vector<8x32xf32>
    %122 = arith.mulf %116, %121 : vector<8x32xf32>
    %c16_41 = arith.constant 16 : index
    %c0_42 = arith.constant 0 : index
    %123 = vector.load %arg5[%c16_41, %c0_42] : memref<136x32xf32, #tpu.memory_space<vmem>>, vector<8x32xf32>
    tpu.vector_store %arg5[%c16_41, %c0_42], %122 {strides = array<i32>} : memref<136x32xf32, #tpu.memory_space<vmem>>, vector<8x32xf32>,
    %c32_43 = arith.constant 32 : index
    %c0_44 = arith.constant 0 : index
    %124 = vector.load %arg4[%c32_43, %c0_44] : memref<144x128xf32, #tpu.memory_space<vmem>>, vector<8x128xf32>
    %cst_45 = arith.constant dense<0.000000e+00> : vector<8x128xf32>
    %125 = tpu.matmul %116, %16, %cst_45 {dimension_numbers = #tpu.dot_dimension_numbers<[1], [0], [0], [1], [0, 0, 1, 1], [], []>} : vector<8x32xf32>, vector<32x128xf32>, vector<8x128xf32> -> vector<8x128xf32>
    %126 = arith.addf %124, %125 : vector<8x128xf32>
    %127 = arith.negf %126 : vector<8x128xf32>
    %128 = math.exp %127 : vector<8x128xf32>
    %cst_46 = arith.constant 1.000000e+00 : f32
    %129 = vector.broadcast %cst_46 : f32 to vector<8x128xf32>
    %130 = arith.addf %129, %128 : vector<8x128xf32>
    %131 = arith.divf %129, %130 : vector<8x128xf32>
    %132 = vector.extract_strided_slice %131 {offsets = [0, 0], sizes = [8, 32], strides = [1, 1]} : vector<8x128xf32> to vector<8x32xf32>
    %133 = vector.extract_strided_slice %131 {offsets = [0, 32], sizes = [8, 32], strides = [1, 1]} : vector<8x128xf32> to vector<8x32xf32>
    %134 = vector.extract_strided_slice %131 {offsets = [0, 64], sizes = [8, 32], strides = [1, 1]} : vector<8x128xf32> to vector<8x32xf32>
    %cst_47 = arith.constant 2.000000e+00 : f32
    %135 = vector.broadcast %cst_47 : f32 to vector<8x32xf32>
    %136 = arith.mulf %135, %134 : vector<8x32xf32>
    %cst_48 = arith.constant 1.000000e+00 : f32
    %137 = vector.broadcast %cst_48 : f32 to vector<8x32xf32>
    %138 = arith.subf %136, %137 : vector<8x32xf32>
    %139 = vector.extract_strided_slice %131 {offsets = [0, 96], sizes = [8, 32], strides = [1, 1]} : vector<8x128xf32> to vector<8x32xf32>
    %140 = arith.mulf %133, %114 : vector<8x32xf32>
    %141 = arith.mulf %132, %138 : vector<8x32xf32>
    %142 = arith.addf %140, %141 : vector<8x32xf32>
    %143 = math.tanh %142 : vector<8x32xf32>
    %144 = arith.mulf %139, %143 : vector<8x32xf32>
    %c3_i32 = arith.constant 3 : i32
    %145 = vector.broadcast %c3_i32 : i32 to vector<8x1xi32>
    %146 = arith.cmpi sgt, %15, %145 : vector<8x1xi32>
    %147 = arith.extui %146 : vector<8x1xi1> to vector<8x1xi32>
    %148 = arith.sitofp %147 : vector<8x1xi32> to vector<8x1xf32>
    %149 = vector.broadcast %148 : vector<8x1xf32> to vector<8x32xf32>
    %150 = arith.mulf %144, %149 : vector<8x32xf32>
    %c24_49 = arith.constant 24 : index
    %c0_50 = arith.constant 0 : index
    %151 = vector.load %arg5[%c24_49, %c0_50] : memref<136x32xf32, #tpu.memory_space<vmem>>, vector<8x32xf32>
    tpu.vector_store %arg5[%c24_49, %c0_50], %150 {strides = array<i32>} : memref<136x32xf32, #tpu.memory_space<vmem>>, vector<8x32xf32>,
    %c40 = arith.constant 40 : index
    %c0_51 = arith.constant 0 : index
    %152 = vector.load %arg4[%c40, %c0_51] : memref<144x128xf32, #tpu.memory_space<vmem>>, vector<8x128xf32>
    %cst_52 = arith.constant dense<0.000000e+00> : vector<8x128xf32>
    %153 = tpu.matmul %144, %16, %cst_52 {dimension_numbers = #tpu.dot_dimension_numbers<[1], [0], [0], [1], [0, 0, 1, 1], [], []>} : vector<8x32xf32>, vector<32x128xf32>, vector<8x128xf32> -> vector<8x128xf32>
    %154 = arith.addf %152, %153 : vector<8x128xf32>
    %155 = arith.negf %154 : vector<8x128xf32>
    %156 = math.exp %155 : vector<8x128xf32>
    %cst_53 = arith.constant 1.000000e+00 : f32
    %157 = vector.broadcast %cst_53 : f32 to vector<8x128xf32>
    %158 = arith.addf %157, %156 : vector<8x128xf32>
    %159 = arith.divf %157, %158 : vector<8x128xf32>
    %160 = vector.extract_strided_slice %159 {offsets = [0, 0], sizes = [8, 32], strides = [1, 1]} : vector<8x128xf32> to vector<8x32xf32>
    %161 = vector.extract_strided_slice %159 {offsets = [0, 32], sizes = [8, 32], strides = [1, 1]} : vector<8x128xf32> to vector<8x32xf32>
    %162 = vector.extract_strided_slice %159 {offsets = [0, 64], sizes = [8, 32], strides = [1, 1]} : vector<8x128xf32> to vector<8x32xf32>
    %cst_54 = arith.constant 2.000000e+00 : f32
    %163 = vector.broadcast %cst_54 : f32 to vector<8x32xf32>
    %164 = arith.mulf %163, %162 : vector<8x32xf32>
    %cst_55 = arith.constant 1.000000e+00 : f32
    %165 = vector.broadcast %cst_55 : f32 to vector<8x32xf32>
    %166 = arith.subf %164, %165 : vector<8x32xf32>
    %167 = vector.extract_strided_slice %159 {offsets = [0, 96], sizes = [8, 32], strides = [1, 1]} : vector<8x128xf32> to vector<8x32xf32>
    %168 = arith.mulf %161, %142 : vector<8x32xf32>
    %169 = arith.mulf %160, %166 : vector<8x32xf32>
    %170 = arith.addf %168, %169 : vector<8x32xf32>
    %171 = math.tanh %170 : vector<8x32xf32>
    %172 = arith.mulf %167, %171 : vector<8x32xf32>
    %c4_i32 = arith.constant 4 : i32
    %173 = vector.broadcast %c4_i32 : i32 to vector<8x1xi32>
    %174 = arith.cmpi sgt, %15, %173 : vector<8x1xi32>
    %175 = arith.extui %174 : vector<8x1xi1> to vector<8x1xi32>
    %176 = arith.sitofp %175 : vector<8x1xi32> to vector<8x1xf32>
    %177 = vector.broadcast %176 : vector<8x1xf32> to vector<8x32xf32>
    %178 = arith.mulf %172, %177 : vector<8x32xf32>
    %c32_56 = arith.constant 32 : index
    %c0_57 = arith.constant 0 : index
    %179 = vector.load %arg5[%c32_56, %c0_57] : memref<136x32xf32, #tpu.memory_space<vmem>>, vector<8x32xf32>
    tpu.vector_store %arg5[%c32_56, %c0_57], %178 {strides = array<i32>} : memref<136x32xf32, #tpu.memory_space<vmem>>, vector<8x32xf32>,
    %c48 = arith.constant 48 : index
    %c0_58 = arith.constant 0 : index
    %180 = vector.load %arg4[%c48, %c0_58] : memref<144x128xf32, #tpu.memory_space<vmem>>, vector<8x128xf32>
    %cst_59 = arith.constant dense<0.000000e+00> : vector<8x128xf32>
    %181 = tpu.matmul %172, %16, %cst_59 {dimension_numbers = #tpu.dot_dimension_numbers<[1], [0], [0], [1], [0, 0, 1, 1], [], []>} : vector<8x32xf32>, vector<32x128xf32>, vector<8x128xf32> -> vector<8x128xf32>
    %182 = arith.addf %180, %181 : vector<8x128xf32>
    %183 = arith.negf %182 : vector<8x128xf32>
    %184 = math.exp %183 : vector<8x128xf32>
    %cst_60 = arith.constant 1.000000e+00 : f32
    %185 = vector.broadcast %cst_60 : f32 to vector<8x128xf32>
    %186 = arith.addf %185, %184 : vector<8x128xf32>
    %187 = arith.divf %185, %186 : vector<8x128xf32>
    %188 = vector.extract_strided_slice %187 {offsets = [0, 0], sizes = [8, 32], strides = [1, 1]} : vector<8x128xf32> to vector<8x32xf32>
    %189 = vector.extract_strided_slice %187 {offsets = [0, 32], sizes = [8, 32], strides = [1, 1]} : vector<8x128xf32> to vector<8x32xf32>
    %190 = vector.extract_strided_slice %187 {offsets = [0, 64], sizes = [8, 32], strides = [1, 1]} : vector<8x128xf32> to vector<8x32xf32>
    %cst_61 = arith.constant 2.000000e+00 : f32
    %191 = vector.broadcast %cst_61 : f32 to vector<8x32xf32>
    %192 = arith.mulf %191, %190 : vector<8x32xf32>
    %cst_62 = arith.constant 1.000000e+00 : f32
    %193 = vector.broadcast %cst_62 : f32 to vector<8x32xf32>
    %194 = arith.subf %192, %193 : vector<8x32xf32>
    %195 = vector.extract_strided_slice %187 {offsets = [0, 96], sizes = [8, 32], strides = [1, 1]} : vector<8x128xf32> to vector<8x32xf32>
    %196 = arith.mulf %189, %170 : vector<8x32xf32>
    %197 = arith.mulf %188, %194 : vector<8x32xf32>
    %198 = arith.addf %196, %197 : vector<8x32xf32>
    %199 = math.tanh %198 : vector<8x32xf32>
    %200 = arith.mulf %195, %199 : vector<8x32xf32>
    %c5_i32 = arith.constant 5 : i32
    %201 = vector.broadcast %c5_i32 : i32 to vector<8x1xi32>
    %202 = arith.cmpi sgt, %15, %201 : vector<8x1xi32>
    %203 = arith.extui %202 : vector<8x1xi1> to vector<8x1xi32>
    %204 = arith.sitofp %203 : vector<8x1xi32> to vector<8x1xf32>
    %205 = vector.broadcast %204 : vector<8x1xf32> to vector<8x32xf32>
    %206 = arith.mulf %200, %205 : vector<8x32xf32>
    %c40_63 = arith.constant 40 : index
    %c0_64 = arith.constant 0 : index
    %207 = vector.load %arg5[%c40_63, %c0_64] : memref<136x32xf32, #tpu.memory_space<vmem>>, vector<8x32xf32>
    tpu.vector_store %arg5[%c40_63, %c0_64], %206 {strides = array<i32>} : memref<136x32xf32, #tpu.memory_space<vmem>>, vector<8x32xf32>,
    %c56 = arith.constant 56 : index
    %c0_65 = arith.constant 0 : index
    %208 = vector.load %arg4[%c56, %c0_65] : memref<144x128xf32, #tpu.memory_space<vmem>>, vector<8x128xf32>
    %cst_66 = arith.constant dense<0.000000e+00> : vector<8x128xf32>
    %209 = tpu.matmul %200, %16, %cst_66 {dimension_numbers = #tpu.dot_dimension_numbers<[1], [0], [0], [1], [0, 0, 1, 1], [], []>} : vector<8x32xf32>, vector<32x128xf32>, vector<8x128xf32> -> vector<8x128xf32>
    %210 = arith.addf %208, %209 : vector<8x128xf32>
    %211 = arith.negf %210 : vector<8x128xf32>
    %212 = math.exp %211 : vector<8x128xf32>
    %cst_67 = arith.constant 1.000000e+00 : f32
    %213 = vector.broadcast %cst_67 : f32 to vector<8x128xf32>
    %214 = arith.addf %213, %212 : vector<8x128xf32>
    %215 = arith.divf %213, %214 : vector<8x128xf32>
    %216 = vector.extract_strided_slice %215 {offsets = [0, 0], sizes = [8, 32], strides = [1, 1]} : vector<8x128xf32> to vector<8x32xf32>
    %217 = vector.extract_strided_slice %215 {offsets = [0, 32], sizes = [8, 32], strides = [1, 1]} : vector<8x128xf32> to vector<8x32xf32>
    %218 = vector.extract_strided_slice %215 {offsets = [0, 64], sizes = [8, 32], strides = [1, 1]} : vector<8x128xf32> to vector<8x32xf32>
    %cst_68 = arith.constant 2.000000e+00 : f32
    %219 = vector.broadcast %cst_68 : f32 to vector<8x32xf32>
    %220 = arith.mulf %219, %218 : vector<8x32xf32>
    %cst_69 = arith.constant 1.000000e+00 : f32
    %221 = vector.broadcast %cst_69 : f32 to vector<8x32xf32>
    %222 = arith.subf %220, %221 : vector<8x32xf32>
    %223 = vector.extract_strided_slice %215 {offsets = [0, 96], sizes = [8, 32], strides = [1, 1]} : vector<8x128xf32> to vector<8x32xf32>
    %224 = arith.mulf %217, %198 : vector<8x32xf32>
    %225 = arith.mulf %216, %222 : vector<8x32xf32>
    %226 = arith.addf %224, %225 : vector<8x32xf32>
    %227 = math.tanh %226 : vector<8x32xf32>
    %228 = arith.mulf %223, %227 : vector<8x32xf32>
    %c6_i32 = arith.constant 6 : i32
    %229 = vector.broadcast %c6_i32 : i32 to vector<8x1xi32>
    %230 = arith.cmpi sgt, %15, %229 : vector<8x1xi32>
    %231 = arith.extui %230 : vector<8x1xi1> to vector<8x1xi32>
    %232 = arith.sitofp %231 : vector<8x1xi32> to vector<8x1xf32>
    %233 = vector.broadcast %232 : vector<8x1xf32> to vector<8x32xf32>
    %234 = arith.mulf %228, %233 : vector<8x32xf32>
    %c48_70 = arith.constant 48 : index
    %c0_71 = arith.constant 0 : index
    %235 = vector.load %arg5[%c48_70, %c0_71] : memref<136x32xf32, #tpu.memory_space<vmem>>, vector<8x32xf32>
    tpu.vector_store %arg5[%c48_70, %c0_71], %234 {strides = array<i32>} : memref<136x32xf32, #tpu.memory_space<vmem>>, vector<8x32xf32>,
    %c64 = arith.constant 64 : index
    %c0_72 = arith.constant 0 : index
    %236 = vector.load %arg4[%c64, %c0_72] : memref<144x128xf32, #tpu.memory_space<vmem>>, vector<8x128xf32>
    %cst_73 = arith.constant dense<0.000000e+00> : vector<8x128xf32>
    %237 = tpu.matmul %228, %16, %cst_73 {dimension_numbers = #tpu.dot_dimension_numbers<[1], [0], [0], [1], [0, 0, 1, 1], [], []>} : vector<8x32xf32>, vector<32x128xf32>, vector<8x128xf32> -> vector<8x128xf32>
    %238 = arith.addf %236, %237 : vector<8x128xf32>
    %239 = arith.negf %238 : vector<8x128xf32>
    %240 = math.exp %239 : vector<8x128xf32>
    %cst_74 = arith.constant 1.000000e+00 : f32
    %241 = vector.broadcast %cst_74 : f32 to vector<8x128xf32>
    %242 = arith.addf %241, %240 : vector<8x128xf32>
    %243 = arith.divf %241, %242 : vector<8x128xf32>
    %244 = vector.extract_strided_slice %243 {offsets = [0, 0], sizes = [8, 32], strides = [1, 1]} : vector<8x128xf32> to vector<8x32xf32>
    %245 = vector.extract_strided_slice %243 {offsets = [0, 32], sizes = [8, 32], strides = [1, 1]} : vector<8x128xf32> to vector<8x32xf32>
    %246 = vector.extract_strided_slice %243 {offsets = [0, 64], sizes = [8, 32], strides = [1, 1]} : vector<8x128xf32> to vector<8x32xf32>
    %cst_75 = arith.constant 2.000000e+00 : f32
    %247 = vector.broadcast %cst_75 : f32 to vector<8x32xf32>
    %248 = arith.mulf %247, %246 : vector<8x32xf32>
    %cst_76 = arith.constant 1.000000e+00 : f32
    %249 = vector.broadcast %cst_76 : f32 to vector<8x32xf32>
    %250 = arith.subf %248, %249 : vector<8x32xf32>
    %251 = vector.extract_strided_slice %243 {offsets = [0, 96], sizes = [8, 32], strides = [1, 1]} : vector<8x128xf32> to vector<8x32xf32>
    %252 = arith.mulf %245, %226 : vector<8x32xf32>
    %253 = arith.mulf %244, %250 : vector<8x32xf32>
    %254 = arith.addf %252, %253 : vector<8x32xf32>
    %255 = math.tanh %254 : vector<8x32xf32>
    %256 = arith.mulf %251, %255 : vector<8x32xf32>
    %c7_i32 = arith.constant 7 : i32
    %257 = vector.broadcast %c7_i32 : i32 to vector<8x1xi32>
    %258 = arith.cmpi sgt, %15, %257 : vector<8x1xi32>
    %259 = arith.extui %258 : vector<8x1xi1> to vector<8x1xi32>
    %260 = arith.sitofp %259 : vector<8x1xi32> to vector<8x1xf32>
    %261 = vector.broadcast %260 : vector<8x1xf32> to vector<8x32xf32>
    %262 = arith.mulf %256, %261 : vector<8x32xf32>
    %c56_77 = arith.constant 56 : index
    %c0_78 = arith.constant 0 : index
    %263 = vector.load %arg5[%c56_77, %c0_78] : memref<136x32xf32, #tpu.memory_space<vmem>>, vector<8x32xf32>
    tpu.vector_store %arg5[%c56_77, %c0_78], %262 {strides = array<i32>} : memref<136x32xf32, #tpu.memory_space<vmem>>, vector<8x32xf32>,
    %c72 = arith.constant 72 : index
    %c0_79 = arith.constant 0 : index
    %264 = vector.load %arg4[%c72, %c0_79] : memref<144x128xf32, #tpu.memory_space<vmem>>, vector<8x128xf32>
    %cst_80 = arith.constant dense<0.000000e+00> : vector<8x128xf32>
    %265 = tpu.matmul %256, %16, %cst_80 {dimension_numbers = #tpu.dot_dimension_numbers<[1], [0], [0], [1], [0, 0, 1, 1], [], []>} : vector<8x32xf32>, vector<32x128xf32>, vector<8x128xf32> -> vector<8x128xf32>
    %266 = arith.addf %264, %265 : vector<8x128xf32>
    %267 = arith.negf %266 : vector<8x128xf32>
    %268 = math.exp %267 : vector<8x128xf32>
    %cst_81 = arith.constant 1.000000e+00 : f32
    %269 = vector.broadcast %cst_81 : f32 to vector<8x128xf32>
    %270 = arith.addf %269, %268 : vector<8x128xf32>
    %271 = arith.divf %269, %270 : vector<8x128xf32>
    %272 = vector.extract_strided_slice %271 {offsets = [0, 0], sizes = [8, 32], strides = [1, 1]} : vector<8x128xf32> to vector<8x32xf32>
    %273 = vector.extract_strided_slice %271 {offsets = [0, 32], sizes = [8, 32], strides = [1, 1]} : vector<8x128xf32> to vector<8x32xf32>
    %274 = vector.extract_strided_slice %271 {offsets = [0, 64], sizes = [8, 32], strides = [1, 1]} : vector<8x128xf32> to vector<8x32xf32>
    %cst_82 = arith.constant 2.000000e+00 : f32
    %275 = vector.broadcast %cst_82 : f32 to vector<8x32xf32>
    %276 = arith.mulf %275, %274 : vector<8x32xf32>
    %cst_83 = arith.constant 1.000000e+00 : f32
    %277 = vector.broadcast %cst_83 : f32 to vector<8x32xf32>
    %278 = arith.subf %276, %277 : vector<8x32xf32>
    %279 = vector.extract_strided_slice %271 {offsets = [0, 96], sizes = [8, 32], strides = [1, 1]} : vector<8x128xf32> to vector<8x32xf32>
    %280 = arith.mulf %273, %254 : vector<8x32xf32>
    %281 = arith.mulf %272, %278 : vector<8x32xf32>
    %282 = arith.addf %280, %281 : vector<8x32xf32>
    %283 = math.tanh %282 : vector<8x32xf32>
    %284 = arith.mulf %279, %283 : vector<8x32xf32>
    %c8_i32 = arith.constant 8 : i32
    %285 = vector.broadcast %c8_i32 : i32 to vector<8x1xi32>
    %286 = arith.cmpi sgt, %15, %285 : vector<8x1xi32>
    %287 = arith.extui %286 : vector<8x1xi1> to vector<8x1xi32>
    %288 = arith.sitofp %287 : vector<8x1xi32> to vector<8x1xf32>
    %289 = vector.broadcast %288 : vector<8x1xf32> to vector<8x32xf32>
    %290 = arith.mulf %284, %289 : vector<8x32xf32>
    %c64_84 = arith.constant 64 : index
    %c0_85 = arith.constant 0 : index
    %291 = vector.load %arg5[%c64_84, %c0_85] : memref<136x32xf32, #tpu.memory_space<vmem>>, vector<8x32xf32>
    tpu.vector_store %arg5[%c64_84, %c0_85], %290 {strides = array<i32>} : memref<136x32xf32, #tpu.memory_space<vmem>>, vector<8x32xf32>,
    %c80 = arith.constant 80 : index
    %c0_86 = arith.constant 0 : index
    %292 = vector.load %arg4[%c80, %c0_86] : memref<144x128xf32, #tpu.memory_space<vmem>>, vector<8x128xf32>
    %cst_87 = arith.constant dense<0.000000e+00> : vector<8x128xf32>
    %293 = tpu.matmul %284, %16, %cst_87 {dimension_numbers = #tpu.dot_dimension_numbers<[1], [0], [0], [1], [0, 0, 1, 1], [], []>} : vector<8x32xf32>, vector<32x128xf32>, vector<8x128xf32> -> vector<8x128xf32>
    %294 = arith.addf %292, %293 : vector<8x128xf32>
    %295 = arith.negf %294 : vector<8x128xf32>
    %296 = math.exp %295 : vector<8x128xf32>
    %cst_88 = arith.constant 1.000000e+00 : f32
    %297 = vector.broadcast %cst_88 : f32 to vector<8x128xf32>
    %298 = arith.addf %297, %296 : vector<8x128xf32>
    %299 = arith.divf %297, %298 : vector<8x128xf32>
    %300 = vector.extract_strided_slice %299 {offsets = [0, 0], sizes = [8, 32], strides = [1, 1]} : vector<8x128xf32> to vector<8x32xf32>
    %301 = vector.extract_strided_slice %299 {offsets = [0, 32], sizes = [8, 32], strides = [1, 1]} : vector<8x128xf32> to vector<8x32xf32>
    %302 = vector.extract_strided_slice %299 {offsets = [0, 64], sizes = [8, 32], strides = [1, 1]} : vector<8x128xf32> to vector<8x32xf32>
    %cst_89 = arith.constant 2.000000e+00 : f32
    %303 = vector.broadcast %cst_89 : f32 to vector<8x32xf32>
    %304 = arith.mulf %303, %302 : vector<8x32xf32>
    %cst_90 = arith.constant 1.000000e+00 : f32
    %305 = vector.broadcast %cst_90 : f32 to vector<8x32xf32>
    %306 = arith.subf %304, %305 : vector<8x32xf32>
    %307 = vector.extract_strided_slice %299 {offsets = [0, 96], sizes = [8, 32], strides = [1, 1]} : vector<8x128xf32> to vector<8x32xf32>
    %308 = arith.mulf %301, %282 : vector<8x32xf32>
    %309 = arith.mulf %300, %306 : vector<8x32xf32>
    %310 = arith.addf %308, %309 : vector<8x32xf32>
    %311 = math.tanh %310 : vector<8x32xf32>
    %312 = arith.mulf %307, %311 : vector<8x32xf32>
    %c9_i32 = arith.constant 9 : i32
    %313 = vector.broadcast %c9_i32 : i32 to vector<8x1xi32>
    %314 = arith.cmpi sgt, %15, %313 : vector<8x1xi32>
    %315 = arith.extui %314 : vector<8x1xi1> to vector<8x1xi32>
    %316 = arith.sitofp %315 : vector<8x1xi32> to vector<8x1xf32>
    %317 = vector.broadcast %316 : vector<8x1xf32> to vector<8x32xf32>
    %318 = arith.mulf %312, %317 : vector<8x32xf32>
    %c72_91 = arith.constant 72 : index
    %c0_92 = arith.constant 0 : index
    %319 = vector.load %arg5[%c72_91, %c0_92] : memref<136x32xf32, #tpu.memory_space<vmem>>, vector<8x32xf32>
    tpu.vector_store %arg5[%c72_91, %c0_92], %318 {strides = array<i32>} : memref<136x32xf32, #tpu.memory_space<vmem>>, vector<8x32xf32>,
    %c88 = arith.constant 88 : index
    %c0_93 = arith.constant 0 : index
    %320 = vector.load %arg4[%c88, %c0_93] : memref<144x128xf32, #tpu.memory_space<vmem>>, vector<8x128xf32>
    %cst_94 = arith.constant dense<0.000000e+00> : vector<8x128xf32>
    %321 = tpu.matmul %312, %16, %cst_94 {dimension_numbers = #tpu.dot_dimension_numbers<[1], [0], [0], [1], [0, 0, 1, 1], [], []>} : vector<8x32xf32>, vector<32x128xf32>, vector<8x128xf32> -> vector<8x128xf32>
    %322 = arith.addf %320, %321 : vector<8x128xf32>
    %323 = arith.negf %322 : vector<8x128xf32>
    %324 = math.exp %323 : vector<8x128xf32>
    %cst_95 = arith.constant 1.000000e+00 : f32
    %325 = vector.broadcast %cst_95 : f32 to vector<8x128xf32>
    %326 = arith.addf %325, %324 : vector<8x128xf32>
    %327 = arith.divf %325, %326 : vector<8x128xf32>
    %328 = vector.extract_strided_slice %327 {offsets = [0, 0], sizes = [8, 32], strides = [1, 1]} : vector<8x128xf32> to vector<8x32xf32>
    %329 = vector.extract_strided_slice %327 {offsets = [0, 32], sizes = [8, 32], strides = [1, 1]} : vector<8x128xf32> to vector<8x32xf32>
    %330 = vector.extract_strided_slice %327 {offsets = [0, 64], sizes = [8, 32], strides = [1, 1]} : vector<8x128xf32> to vector<8x32xf32>
    %cst_96 = arith.constant 2.000000e+00 : f32
    %331 = vector.broadcast %cst_96 : f32 to vector<8x32xf32>
    %332 = arith.mulf %331, %330 : vector<8x32xf32>
    %cst_97 = arith.constant 1.000000e+00 : f32
    %333 = vector.broadcast %cst_97 : f32 to vector<8x32xf32>
    %334 = arith.subf %332, %333 : vector<8x32xf32>
    %335 = vector.extract_strided_slice %327 {offsets = [0, 96], sizes = [8, 32], strides = [1, 1]} : vector<8x128xf32> to vector<8x32xf32>
    %336 = arith.mulf %329, %310 : vector<8x32xf32>
    %337 = arith.mulf %328, %334 : vector<8x32xf32>
    %338 = arith.addf %336, %337 : vector<8x32xf32>
    %339 = math.tanh %338 : vector<8x32xf32>
    %340 = arith.mulf %335, %339 : vector<8x32xf32>
    %c10_i32 = arith.constant 10 : i32
    %341 = vector.broadcast %c10_i32 : i32 to vector<8x1xi32>
    %342 = arith.cmpi sgt, %15, %341 : vector<8x1xi32>
    %343 = arith.extui %342 : vector<8x1xi1> to vector<8x1xi32>
    %344 = arith.sitofp %343 : vector<8x1xi32> to vector<8x1xf32>
    %345 = vector.broadcast %344 : vector<8x1xf32> to vector<8x32xf32>
    %346 = arith.mulf %340, %345 : vector<8x32xf32>
    %c80_98 = arith.constant 80 : index
    %c0_99 = arith.constant 0 : index
    %347 = vector.load %arg5[%c80_98, %c0_99] : memref<136x32xf32, #tpu.memory_space<vmem>>, vector<8x32xf32>
    tpu.vector_store %arg5[%c80_98, %c0_99], %346 {strides = array<i32>} : memref<136x32xf32, #tpu.memory_space<vmem>>, vector<8x32xf32>,
    %c96_100 = arith.constant 96 : index
    %c0_101 = arith.constant 0 : index
    %348 = vector.load %arg4[%c96_100, %c0_101] : memref<144x128xf32, #tpu.memory_space<vmem>>, vector<8x128xf32>
    %cst_102 = arith.constant dense<0.000000e+00> : vector<8x128xf32>
    %349 = tpu.matmul %340, %16, %cst_102 {dimension_numbers = #tpu.dot_dimension_numbers<[1], [0], [0], [1], [0, 0, 1, 1], [], []>} : vector<8x32xf32>, vector<32x128xf32>, vector<8x128xf32> -> vector<8x128xf32>
    %350 = arith.addf %348, %349 : vector<8x128xf32>
    %351 = arith.negf %350 : vector<8x128xf32>
    %352 = math.exp %351 : vector<8x128xf32>
    %cst_103 = arith.constant 1.000000e+00 : f32
    %353 = vector.broadcast %cst_103 : f32 to vector<8x128xf32>
    %354 = arith.addf %353, %352 : vector<8x128xf32>
    %355 = arith.divf %353, %354 : vector<8x128xf32>
    %356 = vector.extract_strided_slice %355 {offsets = [0, 0], sizes = [8, 32], strides = [1, 1]} : vector<8x128xf32> to vector<8x32xf32>
    %357 = vector.extract_strided_slice %355 {offsets = [0, 32], sizes = [8, 32], strides = [1, 1]} : vector<8x128xf32> to vector<8x32xf32>
    %358 = vector.extract_strided_slice %355 {offsets = [0, 64], sizes = [8, 32], strides = [1, 1]} : vector<8x128xf32> to vector<8x32xf32>
    %cst_104 = arith.constant 2.000000e+00 : f32
    %359 = vector.broadcast %cst_104 : f32 to vector<8x32xf32>
    %360 = arith.mulf %359, %358 : vector<8x32xf32>
    %cst_105 = arith.constant 1.000000e+00 : f32
    %361 = vector.broadcast %cst_105 : f32 to vector<8x32xf32>
    %362 = arith.subf %360, %361 : vector<8x32xf32>
    %363 = vector.extract_strided_slice %355 {offsets = [0, 96], sizes = [8, 32], strides = [1, 1]} : vector<8x128xf32> to vector<8x32xf32>
    %364 = arith.mulf %357, %338 : vector<8x32xf32>
    %365 = arith.mulf %356, %362 : vector<8x32xf32>
    %366 = arith.addf %364, %365 : vector<8x32xf32>
    %367 = math.tanh %366 : vector<8x32xf32>
    %368 = arith.mulf %363, %367 : vector<8x32xf32>
    %c11_i32 = arith.constant 11 : i32
    %369 = vector.broadcast %c11_i32 : i32 to vector<8x1xi32>
    %370 = arith.cmpi sgt, %15, %369 : vector<8x1xi32>
    %371 = arith.extui %370 : vector<8x1xi1> to vector<8x1xi32>
    %372 = arith.sitofp %371 : vector<8x1xi32> to vector<8x1xf32>
    %373 = vector.broadcast %372 : vector<8x1xf32> to vector<8x32xf32>
    %374 = arith.mulf %368, %373 : vector<8x32xf32>
    %c88_106 = arith.constant 88 : index
    %c0_107 = arith.constant 0 : index
    %375 = vector.load %arg5[%c88_106, %c0_107] : memref<136x32xf32, #tpu.memory_space<vmem>>, vector<8x32xf32>
    tpu.vector_store %arg5[%c88_106, %c0_107], %374 {strides = array<i32>} : memref<136x32xf32, #tpu.memory_space<vmem>>, vector<8x32xf32>,
    %c104 = arith.constant 104 : index
    %c0_108 = arith.constant 0 : index
    %376 = vector.load %arg4[%c104, %c0_108] : memref<144x128xf32, #tpu.memory_space<vmem>>, vector<8x128xf32>
    %cst_109 = arith.constant dense<0.000000e+00> : vector<8x128xf32>
    %377 = tpu.matmul %368, %16, %cst_109 {dimension_numbers = #tpu.dot_dimension_numbers<[1], [0], [0], [1], [0, 0, 1, 1], [], []>} : vector<8x32xf32>, vector<32x128xf32>, vector<8x128xf32> -> vector<8x128xf32>
    %378 = arith.addf %376, %377 : vector<8x128xf32>
    %379 = arith.negf %378 : vector<8x128xf32>
    %380 = math.exp %379 : vector<8x128xf32>
    %cst_110 = arith.constant 1.000000e+00 : f32
    %381 = vector.broadcast %cst_110 : f32 to vector<8x128xf32>
    %382 = arith.addf %381, %380 : vector<8x128xf32>
    %383 = arith.divf %381, %382 : vector<8x128xf32>
    %384 = vector.extract_strided_slice %383 {offsets = [0, 0], sizes = [8, 32], strides = [1, 1]} : vector<8x128xf32> to vector<8x32xf32>
    %385 = vector.extract_strided_slice %383 {offsets = [0, 32], sizes = [8, 32], strides = [1, 1]} : vector<8x128xf32> to vector<8x32xf32>
    %386 = vector.extract_strided_slice %383 {offsets = [0, 64], sizes = [8, 32], strides = [1, 1]} : vector<8x128xf32> to vector<8x32xf32>
    %cst_111 = arith.constant 2.000000e+00 : f32
    %387 = vector.broadcast %cst_111 : f32 to vector<8x32xf32>
    %388 = arith.mulf %387, %386 : vector<8x32xf32>
    %cst_112 = arith.constant 1.000000e+00 : f32
    %389 = vector.broadcast %cst_112 : f32 to vector<8x32xf32>
    %390 = arith.subf %388, %389 : vector<8x32xf32>
    %391 = vector.extract_strided_slice %383 {offsets = [0, 96], sizes = [8, 32], strides = [1, 1]} : vector<8x128xf32> to vector<8x32xf32>
    %392 = arith.mulf %385, %366 : vector<8x32xf32>
    %393 = arith.mulf %384, %390 : vector<8x32xf32>
    %394 = arith.addf %392, %393 : vector<8x32xf32>
    %395 = math.tanh %394 : vector<8x32xf32>
    %396 = arith.mulf %391, %395 : vector<8x32xf32>
    %c12_i32 = arith.constant 12 : i32
    %397 = vector.broadcast %c12_i32 : i32 to vector<8x1xi32>
    %398 = arith.cmpi sgt, %15, %397 : vector<8x1xi32>
    %399 = arith.extui %398 : vector<8x1xi1> to vector<8x1xi32>
    %400 = arith.sitofp %399 : vector<8x1xi32> to vector<8x1xf32>
    %401 = vector.broadcast %400 : vector<8x1xf32> to vector<8x32xf32>
    %402 = arith.mulf %396, %401 : vector<8x32xf32>
    %c96_113 = arith.constant 96 : index
    %c0_114 = arith.constant 0 : index
    %403 = vector.load %arg5[%c96_113, %c0_114] : memref<136x32xf32, #tpu.memory_space<vmem>>, vector<8x32xf32>
    tpu.vector_store %arg5[%c96_113, %c0_114], %402 {strides = array<i32>} : memref<136x32xf32, #tpu.memory_space<vmem>>, vector<8x32xf32>,
    %c112_115 = arith.constant 112 : index
    %c0_116 = arith.constant 0 : index
    %404 = vector.load %arg4[%c112_115, %c0_116] : memref<144x128xf32, #tpu.memory_space<vmem>>, vector<8x128xf32>
    %cst_117 = arith.constant dense<0.000000e+00> : vector<8x128xf32>
    %405 = tpu.matmul %396, %16, %cst_117 {dimension_numbers = #tpu.dot_dimension_numbers<[1], [0], [0], [1], [0, 0, 1, 1], [], []>} : vector<8x32xf32>, vector<32x128xf32>, vector<8x128xf32> -> vector<8x128xf32>
    %406 = arith.addf %404, %405 : vector<8x128xf32>
    %407 = arith.negf %406 : vector<8x128xf32>
    %408 = math.exp %407 : vector<8x128xf32>
    %cst_118 = arith.constant 1.000000e+00 : f32
    %409 = vector.broadcast %cst_118 : f32 to vector<8x128xf32>
    %410 = arith.addf %409, %408 : vector<8x128xf32>
    %411 = arith.divf %409, %410 : vector<8x128xf32>
    %412 = vector.extract_strided_slice %411 {offsets = [0, 0], sizes = [8, 32], strides = [1, 1]} : vector<8x128xf32> to vector<8x32xf32>
    %413 = vector.extract_strided_slice %411 {offsets = [0, 32], sizes = [8, 32], strides = [1, 1]} : vector<8x128xf32> to vector<8x32xf32>
    %414 = vector.extract_strided_slice %411 {offsets = [0, 64], sizes = [8, 32], strides = [1, 1]} : vector<8x128xf32> to vector<8x32xf32>
    %cst_119 = arith.constant 2.000000e+00 : f32
    %415 = vector.broadcast %cst_119 : f32 to vector<8x32xf32>
    %416 = arith.mulf %415, %414 : vector<8x32xf32>
    %cst_120 = arith.constant 1.000000e+00 : f32
    %417 = vector.broadcast %cst_120 : f32 to vector<8x32xf32>
    %418 = arith.subf %416, %417 : vector<8x32xf32>
    %419 = vector.extract_strided_slice %411 {offsets = [0, 96], sizes = [8, 32], strides = [1, 1]} : vector<8x128xf32> to vector<8x32xf32>
    %420 = arith.mulf %413, %394 : vector<8x32xf32>
    %421 = arith.mulf %412, %418 : vector<8x32xf32>
    %422 = arith.addf %420, %421 : vector<8x32xf32>
    %423 = math.tanh %422 : vector<8x32xf32>
    %424 = arith.mulf %419, %423 : vector<8x32xf32>
    %c13_i32 = arith.constant 13 : i32
    %425 = vector.broadcast %c13_i32 : i32 to vector<8x1xi32>
    %426 = arith.cmpi sgt, %15, %425 : vector<8x1xi32>
    %427 = arith.extui %426 : vector<8x1xi1> to vector<8x1xi32>
    %428 = arith.sitofp %427 : vector<8x1xi32> to vector<8x1xf32>
    %429 = vector.broadcast %428 : vector<8x1xf32> to vector<8x32xf32>
    %430 = arith.mulf %424, %429 : vector<8x32xf32>
    %c104_121 = arith.constant 104 : index
    %c0_122 = arith.constant 0 : index
    %431 = vector.load %arg5[%c104_121, %c0_122] : memref<136x32xf32, #tpu.memory_space<vmem>>, vector<8x32xf32>
    tpu.vector_store %arg5[%c104_121, %c0_122], %430 {strides = array<i32>} : memref<136x32xf32, #tpu.memory_space<vmem>>, vector<8x32xf32>,
    %c120 = arith.constant 120 : index
    %c0_123 = arith.constant 0 : index
    %432 = vector.load %arg4[%c120, %c0_123] : memref<144x128xf32, #tpu.memory_space<vmem>>, vector<8x128xf32>
    %cst_124 = arith.constant dense<0.000000e+00> : vector<8x128xf32>
    %433 = tpu.matmul %424, %16, %cst_124 {dimension_numbers = #tpu.dot_dimension_numbers<[1], [0], [0], [1], [0, 0, 1, 1], [], []>} : vector<8x32xf32>, vector<32x128xf32>, vector<8x128xf32> -> vector<8x128xf32>
    %434 = arith.addf %432, %433 : vector<8x128xf32>
    %435 = arith.negf %434 : vector<8x128xf32>
    %436 = math.exp %435 : vector<8x128xf32>
    %cst_125 = arith.constant 1.000000e+00 : f32
    %437 = vector.broadcast %cst_125 : f32 to vector<8x128xf32>
    %438 = arith.addf %437, %436 : vector<8x128xf32>
    %439 = arith.divf %437, %438 : vector<8x128xf32>
    %440 = vector.extract_strided_slice %439 {offsets = [0, 0], sizes = [8, 32], strides = [1, 1]} : vector<8x128xf32> to vector<8x32xf32>
    %441 = vector.extract_strided_slice %439 {offsets = [0, 32], sizes = [8, 32], strides = [1, 1]} : vector<8x128xf32> to vector<8x32xf32>
    %442 = vector.extract_strided_slice %439 {offsets = [0, 64], sizes = [8, 32], strides = [1, 1]} : vector<8x128xf32> to vector<8x32xf32>
    %cst_126 = arith.constant 2.000000e+00 : f32
    %443 = vector.broadcast %cst_126 : f32 to vector<8x32xf32>
    %444 = arith.mulf %443, %442 : vector<8x32xf32>
    %cst_127 = arith.constant 1.000000e+00 : f32
    %445 = vector.broadcast %cst_127 : f32 to vector<8x32xf32>
    %446 = arith.subf %444, %445 : vector<8x32xf32>
    %447 = vector.extract_strided_slice %439 {offsets = [0, 96], sizes = [8, 32], strides = [1, 1]} : vector<8x128xf32> to vector<8x32xf32>
    %448 = arith.mulf %441, %422 : vector<8x32xf32>
    %449 = arith.mulf %440, %446 : vector<8x32xf32>
    %450 = arith.addf %448, %449 : vector<8x32xf32>
    %451 = math.tanh %450 : vector<8x32xf32>
    %452 = arith.mulf %447, %451 : vector<8x32xf32>
    %c14_i32 = arith.constant 14 : i32
    %453 = vector.broadcast %c14_i32 : i32 to vector<8x1xi32>
    %454 = arith.cmpi sgt, %15, %453 : vector<8x1xi32>
    %455 = arith.extui %454 : vector<8x1xi1> to vector<8x1xi32>
    %456 = arith.sitofp %455 : vector<8x1xi32> to vector<8x1xf32>
    %457 = vector.broadcast %456 : vector<8x1xf32> to vector<8x32xf32>
    %458 = arith.mulf %452, %457 : vector<8x32xf32>
    %c112_128 = arith.constant 112 : index
    %c0_129 = arith.constant 0 : index
    %459 = vector.load %arg5[%c112_128, %c0_129] : memref<136x32xf32, #tpu.memory_space<vmem>>, vector<8x32xf32>
    tpu.vector_store %arg5[%c112_128, %c0_129], %458 {strides = array<i32>} : memref<136x32xf32, #tpu.memory_space<vmem>>, vector<8x32xf32>,
    %c128 = arith.constant 128 : index
    %c0_130 = arith.constant 0 : index
    %460 = vector.load %arg4[%c128, %c0_130] : memref<144x128xf32, #tpu.memory_space<vmem>>, vector<8x128xf32>
    %cst_131 = arith.constant dense<0.000000e+00> : vector<8x128xf32>
    %461 = tpu.matmul %452, %16, %cst_131 {dimension_numbers = #tpu.dot_dimension_numbers<[1], [0], [0], [1], [0, 0, 1, 1], [], []>} : vector<8x32xf32>, vector<32x128xf32>, vector<8x128xf32> -> vector<8x128xf32>
    %462 = arith.addf %460, %461 : vector<8x128xf32>
    %463 = arith.negf %462 : vector<8x128xf32>
    %464 = math.exp %463 : vector<8x128xf32>
    %cst_132 = arith.constant 1.000000e+00 : f32
    %465 = vector.broadcast %cst_132 : f32 to vector<8x128xf32>
    %466 = arith.addf %465, %464 : vector<8x128xf32>
    %467 = arith.divf %465, %466 : vector<8x128xf32>
    %468 = vector.extract_strided_slice %467 {offsets = [0, 0], sizes = [8, 32], strides = [1, 1]} : vector<8x128xf32> to vector<8x32xf32>
    %469 = vector.extract_strided_slice %467 {offsets = [0, 32], sizes = [8, 32], strides = [1, 1]} : vector<8x128xf32> to vector<8x32xf32>
    %470 = vector.extract_strided_slice %467 {offsets = [0, 64], sizes = [8, 32], strides = [1, 1]} : vector<8x128xf32> to vector<8x32xf32>
    %cst_133 = arith.constant 2.000000e+00 : f32
    %471 = vector.broadcast %cst_133 : f32 to vector<8x32xf32>
    %472 = arith.mulf %471, %470 : vector<8x32xf32>
    %cst_134 = arith.constant 1.000000e+00 : f32
    %473 = vector.broadcast %cst_134 : f32 to vector<8x32xf32>
    %474 = arith.subf %472, %473 : vector<8x32xf32>
    %475 = vector.extract_strided_slice %467 {offsets = [0, 96], sizes = [8, 32], strides = [1, 1]} : vector<8x128xf32> to vector<8x32xf32>
    %476 = arith.mulf %469, %450 : vector<8x32xf32>
    %477 = arith.mulf %468, %474 : vector<8x32xf32>
    %478 = arith.addf %476, %477 : vector<8x32xf32>
    %479 = math.tanh %478 : vector<8x32xf32>
    %480 = arith.mulf %475, %479 : vector<8x32xf32>
    %c15_i32 = arith.constant 15 : i32
    %481 = vector.broadcast %c15_i32 : i32 to vector<8x1xi32>
    %482 = arith.cmpi sgt, %15, %481 : vector<8x1xi32>
    %483 = arith.extui %482 : vector<8x1xi1> to vector<8x1xi32>
    %484 = arith.sitofp %483 : vector<8x1xi32> to vector<8x1xf32>
    %485 = vector.broadcast %484 : vector<8x1xf32> to vector<8x32xf32>
    %486 = arith.mulf %480, %485 : vector<8x32xf32>
    %c120_135 = arith.constant 120 : index
    %c0_136 = arith.constant 0 : index
    %487 = vector.load %arg5[%c120_135, %c0_136] : memref<136x32xf32, #tpu.memory_space<vmem>>, vector<8x32xf32>
    tpu.vector_store %arg5[%c120_135, %c0_136], %486 {strides = array<i32>} : memref<136x32xf32, #tpu.memory_space<vmem>>, vector<8x32xf32>,
    %c136_137 = arith.constant 136 : index
    %c0_138 = arith.constant 0 : index
    %488 = vector.load %arg4[%c136_137, %c0_138] : memref<144x128xf32, #tpu.memory_space<vmem>>, vector<8x128xf32>
    %cst_139 = arith.constant dense<0.000000e+00> : vector<8x128xf32>
    %489 = tpu.matmul %480, %16, %cst_139 {dimension_numbers = #tpu.dot_dimension_numbers<[1], [0], [0], [1], [0, 0, 1, 1], [], []>} : vector<8x32xf32>, vector<32x128xf32>, vector<8x128xf32> -> vector<8x128xf32>
    %490 = arith.addf %488, %489 : vector<8x128xf32>
    %491 = arith.negf %490 : vector<8x128xf32>
    %492 = math.exp %491 : vector<8x128xf32>
    %cst_140 = arith.constant 1.000000e+00 : f32
    %493 = vector.broadcast %cst_140 : f32 to vector<8x128xf32>
    %494 = arith.addf %493, %492 : vector<8x128xf32>
    %495 = arith.divf %493, %494 : vector<8x128xf32>
    %496 = vector.extract_strided_slice %495 {offsets = [0, 0], sizes = [8, 32], strides = [1, 1]} : vector<8x128xf32> to vector<8x32xf32>
    %497 = vector.extract_strided_slice %495 {offsets = [0, 32], sizes = [8, 32], strides = [1, 1]} : vector<8x128xf32> to vector<8x32xf32>
    %498 = vector.extract_strided_slice %495 {offsets = [0, 64], sizes = [8, 32], strides = [1, 1]} : vector<8x128xf32> to vector<8x32xf32>
    %cst_141 = arith.constant 2.000000e+00 : f32
    %499 = vector.broadcast %cst_141 : f32 to vector<8x32xf32>
    %500 = arith.mulf %499, %498 : vector<8x32xf32>
    %cst_142 = arith.constant 1.000000e+00 : f32
    %501 = vector.broadcast %cst_142 : f32 to vector<8x32xf32>
    %502 = arith.subf %500, %501 : vector<8x32xf32>
    %503 = vector.extract_strided_slice %495 {offsets = [0, 96], sizes = [8, 32], strides = [1, 1]} : vector<8x128xf32> to vector<8x32xf32>
    %504 = arith.mulf %497, %478 : vector<8x32xf32>
    %505 = arith.mulf %496, %502 : vector<8x32xf32>
    %506 = arith.addf %504, %505 : vector<8x32xf32>
    %507 = math.tanh %506 : vector<8x32xf32>
    %508 = arith.mulf %503, %507 : vector<8x32xf32>
    %c16_i32 = arith.constant 16 : i32
    %509 = vector.broadcast %c16_i32 : i32 to vector<8x1xi32>
    %510 = arith.cmpi sgt, %15, %509 : vector<8x1xi32>
    %511 = arith.extui %510 : vector<8x1xi1> to vector<8x1xi32>
    %512 = arith.sitofp %511 : vector<8x1xi32> to vector<8x1xf32>
    %513 = vector.broadcast %512 : vector<8x1xf32> to vector<8x32xf32>
    %514 = arith.mulf %508, %513 : vector<8x32xf32>
    %c128_143 = arith.constant 128 : index
    %c0_144 = arith.constant 0 : index
    %515 = vector.load %arg5[%c128_143, %c0_144] : memref<136x32xf32, #tpu.memory_space<vmem>>, vector<8x32xf32>
    tpu.vector_store %arg5[%c128_143, %c0_144], %514 {strides = array<i32>} : memref<136x32xf32, #tpu.memory_space<vmem>>, vector<8x32xf32>,
    %c0_145 = arith.constant 0 : index
    %c0_146 = arith.constant 0 : index
    %516 = vector.load %arg5[%c0_145, %c0_146] : memref<136x32xf32, #tpu.memory_space<vmem>>, vector<136x32xf32>
    %c64_147 = arith.constant 64 : index
    %c0_148 = arith.constant 0 : index
    %517 = vector.load %arg2[%c64_147, %c0_148] : memref<240x128xf32, #tpu.memory_space<vmem>>, vector<32x128xf32>
    %cst_149 = arith.constant dense<0.000000e+00> : vector<136x128xf32>
    %518 = tpu.matmul %516, %517, %cst_149 {dimension_numbers = #tpu.dot_dimension_numbers<[1], [0], [0], [1], [0, 0, 1, 1], [], []>} : vector<136x32xf32>, vector<32x128xf32>, vector<136x128xf32> -> vector<136x128xf32>
    %c104_150 = arith.constant 104 : index
    %c0_151 = arith.constant 0 : index
    %519 = vector.load %arg2[%c104_150, %c0_151] : memref<240x128xf32, #tpu.memory_space<vmem>>, vector<1x128xf32>
    %520 = vector.broadcast %519 : vector<1x128xf32> to vector<136x128xf32>
    %521 = arith.addf %518, %520 : vector<136x128xf32>
    %c0_152 = arith.constant 0 : index
    %c0_153 = arith.constant 0 : index
    %522 = vector.load %arg3[%c0_152, %c0_153] : memref<136x128xf32, #tpu.memory_space<vmem>>, vector<136x128xf32>
    tpu.vector_store %arg3[%c0_152, %c0_153], %521 {strides = array<i32>} : memref<136x128xf32, #tpu.memory_space<vmem>>, vector<136x128xf32>,
    return
  }
}

</mosaic_0001>

<bundles_post_ra>
// kernel: neg.1
= control target key start
LH: loop header
LB: loop body
LE: loop exit
PB: predicated region body
PF: predicated region fallthrough
CT: control target
= control target key end

     0   :  { %s24_s0 = inlined_call_operand.vmem [shape: s32[8], index: 0, kind: input, shape index: {}]   ;;  %s25_s1 = inlined_call_operand.vmem [shape: s32[8], index: 1, kind: output, shape index: {}]  }
   0x1   :  { %v2_v0 = vld [vmem:[%s24_s0] sm:$0x1] }
   0x2   :  { %v5_v1 = vsub.s32 0, %v2_v0 }
   0x4   :  { %7 = vst [vmem:[%s25_s1] sm:$0x1] %v5_v1 }

// kernel: captioning_forward.1
= control target key start
LH: loop header
LB: loop body
LE: loop exit
PB: predicated region body
PF: predicated region fallthrough
CT: control target
= control target key end

     0   :  { %v3553_v1 = vmov 0.0   ;;  %vm3554_vm0 = vmmov 0   ;;  %s4377_s0 = inlined_call_operand.vmem [shape: f32[8,32], index: 0, kind: input, shape index: {}]   ;;  %s4378_s1 = inlined_call_operand.vmem [shape: s32[144,1], index: 1, kind: input, shape index: {}]   ;;  %s4379_s2 = inlined_call_operand.vmem [shape: f32[240,128], index: 2, kind: input, shape index: {}]   ;;  %s4380_s3 = inlined_call_operand.hbm [shape: f32[136,128], index: 3, kind: output, shape index: {}]  }
   0x1   :  { %v19_v0 = vld [vmem:[%s4379_s2 + $0x18] sm:$0xff]  ;;  %3009 = vmatprep.subr.mxu0 %v3553_v1  ;;  %v18_v2 = vld [vmem:[%s4379_s2 + $0x10] sm:$0xff]  ;;  %3017 = vmatprep.mubr.msk.f32.mxu0 %vm3554_vm0, %v3553_v1  ;;  %v17_v3 = vld [vmem:[%s4379_s2 + $0x8] sm:$0xff] }
   0x2   :  { %3010 = vmatpush3.msra.mxu0 %v19_v0  ;;  %3020 = vmatprep.subr.mxu1 %v3553_v1 }
   0x3   :  { %3011 = vmatprep.subr.mxu0 %v3553_v1  ;;  %3052 = vmatprep.mubr.msk.f32.mxu1 %vm3554_vm0, %v3553_v1 }
   0x4   :  { %8 = vsyncpa [#allocation5], 0  ;;  %3012 = vmatpush3.msra.mxu0 %v18_v2  ;;  %v16_v4 = vld [vmem:[%s4379_s2] sm:$0xff]  ;;  %vm21_vm1 = vcmask 261120   ;;  %v3609_v6 = vld [vmem:[%s4379_s2 + $0x38] sm:$0xff]  ;;  %s3555_s4 = smov 64   ;;  %v113_v49 = vlaneseq }
   0x5   :  { %3013 = vmatprep.subr.mxu0 %v3553_v1  ;;  %v15_v5 = vld [vmem:[%s4377_s0] sm:$0xff]  ;;  %v3616_v7 = vld [vmem:[%s4379_s2 + $0x30] sm:$0xff]  ;;  %v3625_v8 = vld [vmem:[%s4379_s2 + $0x28] sm:$0xff]  ;;  %s3556_s5 = smov 32   ;;  %v3557_v25 = vmov 0   ;;  %v3558_v52 = vmov 1.0  }
   0x6   :  { %3014 = vmatpush3.msra.mxu0 %v17_v3  ;;  %v3632_v9 = vld [vmem:[%s4379_s2 + $0x20] sm:$0xff]  ;;  %3377 = vset.pattern.permute.xlu1 %v3557_v25  ;;  %v232_v29 = vld [vmem:[%s4379_s2 + $0xe8] sm:$0xff]  ;;  %v230_v31 = vld [vmem:[%s4379_s2 + $0xd8] sm:$0xff]  ;;  %v3732_v50 = vand.u32 127, %v113_v49 }
   0x7   :  { %3015 = vmatprep.subr.mxu0 %v3553_v1  ;;  %v20_v12 = vld [vmem:[%s4379_s2 + $0x60] sm:$0xff]  ;;  %3378 = vset.pattern.permute.xlu0 %v3557_v25  ;;  %v229_v32 = vld [vmem:[%s4379_s2 + $0xd0] sm:$0xff]  ;;  %v228_v33 = vld [vmem:[%s4379_s2 + $0xc8] sm:$0xff] }
   0x8   :  { %3016 = vmatpush3.msra.mxu0 %v16_v4  ;;  %v231_v30 = vld [vmem:[%s4379_s2 + $0xe0] sm:$0xff]  ;;  %3021 = vmatpush3.msra.mxu1 %v232_v29  ;;  %v226_v36 = vld [vmem:[%s4379_s2 + $0xb8] sm:$0xff]  ;;  %v225_v38 = vld [vmem:[%s4379_s2 + $0xb0] sm:$0xff] }
   0x9   :  { %3018 = vmatmul.mubr.msk.f32.vlgmr.msra.gmra.mxu0 %vm21_vm1, %v15_v5  ;;  %3103 = vmatprep.subr.mxu0 %v3553_v1  ;;  %v227_v34 = vld [vmem:[%s4379_s2 + $0xc0] sm:$0xff]  ;;  %v224_v39 = vld [vmem:[%s4379_s2 + $0xa8] sm:$0xff]  ;;  %v222_v41 = vld [vmem:[%s4379_s2 + $0x98] sm:$0xff] }
   0xa   :  { %3104 = vmatpush3.msra.mxu0 %v3609_v6  ;;  %3111 = vmatprep.mubr.msk.f32.mxu0 %vm3554_vm0, %v3553_v1  ;;  %v96_v37 = vld [vmem:[%s4378_s1] sm:$0xff]  ;;  %v221_v42 = vld [vmem:[%s4379_s2 + $0x90] sm:$0xff]  ;;  %v220_v43 = vld [vmem:[%s4379_s2 + $0x88] sm:$0xff] }
   0xb   :  { %3105 = vmatprep.subr.mxu0 %v3553_v1  ;;  %3022 = vmatprep.subr.mxu1 %v3553_v1  ;;  %v223_v40 = vld [vmem:[%s4379_s2 + $0xa0] sm:$0xff]  ;;  %v218_v45 = vld [vmem:[%s4379_s2 + $0x78] sm:$0xff]  ;;  %v217_v46 = vld [vmem:[%s4379_s2 + $0x70] sm:$0xff] }
   0xc   :  { %3106 = vmatpush3.msra.mxu0 %v3616_v7  ;;  %3023 = vmatpush3.msra.mxu1 %v231_v30  ;;  %v219_v44 = vld [vmem:[%s4379_s2 + $0x80] sm:$0xff]  ;;  %v97_v4 = vld [vmem:[%s4378_s1 + $0x8] sm:$0xff]  ;;  %v98_v30 = vld [vmem:[%s4378_s1 + $0x10] sm:$0xff] }
   0xd   :  { %3107 = vmatprep.subr.mxu0 %v3553_v1  ;;  %3024 = vmatprep.subr.mxu1 %v3553_v1 }
   0xe   :  { %3108 = vmatpush3.msra.mxu0 %v3625_v8  ;;  %3025 = vmatpush3.msra.mxu1 %v230_v31 }
   0xf   :  { %3109 = vmatprep.subr.mxu0 %v3553_v1  ;;  %3026 = vmatprep.subr.mxu1 %v3553_v1 }
  0x10   :  { %3110 = vmatpush3.msra.mxu0 %v3632_v9  ;;  %3027 = vmatpush3.msra.mxu1 %v229_v32 }
  0x11   :  { %3112 = vmatmul.mubr.f32.vlgmr.msra.gmra.mxu0 %v3553_v1  ;;  %3114 = vmatprep.subr.mxu0 %v3553_v1 }
  0x12   :  { %3115 = vmatpush3.msra.mxu0 %v3609_v6  ;;  %3122 = vmatprep.mubr.msk.f32.mxu0 %vm3554_vm0, %v3553_v1 }
  0x13   :  { %3116 = vmatprep.subr.mxu0 %v3553_v1  ;;  %3028 = vmatprep.subr.mxu1 %v3553_v1 }
  0x14   :  { %3117 = vmatpush3.msra.mxu0 %v3616_v7  ;;  %3029 = vmatpush3.msra.mxu1 %v228_v33 }
  0x15   :  { %3118 = vmatprep.subr.mxu0 %v3553_v1  ;;  %3030 = vmatprep.subr.mxu1 %v3553_v1 }
  0x16   :  { %3119 = vmatpush3.msra.mxu0 %v3625_v8  ;;  %3031 = vmatpush3.msra.mxu1 %v227_v34 }
  0x17   :  { %3120 = vmatprep.subr.mxu0 %v3553_v1  ;;  %3032 = vmatprep.subr.mxu1 %v3553_v1 }
  0x18   :  { %3121 = vmatpush3.msra.mxu0 %v3632_v9  ;;  %3033 = vmatpush3.msra.mxu1 %v226_v36 }
  0x19   :  { %3125 = vmatprep.subr.mxu0 %v3553_v1  ;;  %3034 = vmatprep.subr.mxu1 %v3553_v1 }
  0x1a   :  { %3035 = vmatpush3.msra.mxu1 %v225_v38 }
  0x1b   :  { %3036 = vmatprep.subr.mxu1 %v3553_v1 }
  0x1c   :  { %3037 = vmatpush3.msra.mxu1 %v224_v39 }
  0x1d   :  { %3038 = vmatprep.subr.mxu1 %v3553_v1 }
  0x1e   :  { %3039 = vmatpush3.msra.mxu1 %v223_v40 }
  0x1f   :  { %3040 = vmatprep.subr.mxu1 %v3553_v1 }
  0x20   :  { %3041 = vmatpush3.msra.mxu1 %v222_v41 }
  0x21   :  { %3042 = vmatprep.subr.mxu1 %v3553_v1 }
  0x22   :  { %3043 = vmatpush3.msra.mxu1 %v221_v42 }
  0x23   :  { %3044 = vmatprep.subr.mxu1 %v3553_v1 }
  0x24   :  { %3045 = vmatpush3.msra.mxu1 %v220_v43 }
  0x25   :  { %3046 = vmatprep.subr.mxu1 %v3553_v1 }
  0x26   :  { %3047 = vmatpush3.msra.mxu1 %v219_v44 }
  0x27   :  { %3048 = vmatprep.subr.mxu1 %v3553_v1 }
  0x28   :  { %3049 = vmatpush3.msra.mxu1 %v218_v45 }
  0x29   :  { %3050 = vmatprep.subr.mxu1 %v3553_v1 }
  0x2a   :  { %3051 = vmatpush3.msra.mxu1 %v217_v46 }
  0x2b   :  { %3224 = vmatprep.subr.mxu1 %v3553_v1 }
  0xc9   :  { %v91_v10 = vpop.f32.mrf.mxu0 }
  0xca   :  { %v92_v13 = vadd.f32 %v91_v10, %v20_v12 }
  0xcb   :  { %v3019_v11 = vpop.f32.mrf.mxu0 }
  0xd1   :  { %v475_v14 = vpop.f32.mrf.mxu0 }
  0xd2   :  { %v479_v15 = vadd.f32 %v475_v14, %v92_v13 }
  0xd3   :  { %v3113_v16 = vpop.f32.mrf.mxu0 }
  0xd4   :  { %v2772_v17 = vmul.f32 -1.442695, %v479_v15 }
  0xd6   :  { %3419 = vpow2.f32 %v2772_v17 }
  0xe3   :  { %v3420_v18 = vpop.eup %3419 }
  0xe4   :  { %v483_v19 = vadd.f32 1.0, %v3420_v18 }
  0xe6   :  { %3421 = vrcp.f32 %v483_v19 }
  0xf3   :  { %v3652_v20 = vpop.eup %3421 }
  0xf4   :  { %v486_v21 = vmul.f32 2.0, %v3652_v20  ;;  %v488_v26 = vmul.f32 0.0, %v3652_v20 }
  0xf6   :  { %v2773_v22 = vadd.f32 -1.0, %v486_v21 }
  0xf8   :  { %490 = vrot.lane.b32.xlu0 %v2773_v22, %s3555_s4 }
 0x16a   :  { %v491_v23 = vpop.permute.xlu0 %490 }
 0x16b   :  { %v493_v24 = vmul.f32 %v3652_v20, %v491_v23 }
 0x16d   :  { %495 = vrot.lane.b32.xlu0 %v493_v24, %s3556_s5 }
 0x1df   :  { %v496_v27 = vpop.permute.xlu0 %495 }
 0x1e0   :  { %v3659_v28 = vadd.f32 %v496_v27, %v488_v26 }
 0x1e2   :  { %3423 = vtanh.f32 %v3659_v28 }
 0x1ef   :  { %v3424_v35 = vpop.eup %3423 }
 0x1f0   :  { %501 = vrot.lane.b32.xlu1 %v3424_v35, %s3555_s4 }
 0x1f4   :  { %116 = vperm.xlu1 %3377, %v96_v37  }
 0x262   :  { %v502_v47 = vpop.permute.xlu1 %501 }
 0x263   :  { %v504_v48 = vmul.f32 %v3652_v20, %v502_v47 }
 0x265   :  { %507 = vrot.lane.b32.xlu0 %v504_v48, %s3556_s5 }
 0x26f   :  { %v117_v51 = vpop.permute.xlu1 %116 }
 0x270   :  { %vm166_vm2 = vcmp.eq.s32.totalorder %v3732_v50, %v117_v51 }
 0x271   :  { %3053 = vmatmul.mubr.msk.f32.vlgmr.msra.gmra.mxu1 %vm166_vm2, %v3558_v52 }
 0x272   :  { %3055 = vmatprep.mubr.msk.f32.mxu1 %vm3554_vm0, %v3553_v1  ;;  %3225 = vmatpush3.msra.mxu1 %v3609_v6 }
 0x273   :  { %3226 = vmatprep.subr.mxu1 %v3553_v1 }
 0x274   :  { %3227 = vmatpush3.msra.mxu1 %v3616_v7 }
 0x275   :  { %3228 = vmatprep.subr.mxu1 %v3553_v1 }
 0x276   :  { %3229 = vmatpush3.msra.mxu1 %v3625_v8 }
 0x277   :  { %3230 = vmatprep.subr.mxu1 %v3553_v1 }
 0x278   :  { %3231 = vmatpush3.msra.mxu1 %v3632_v9 }
 0x279   :  { %3246 = vmatprep.subr.mxu1 %v3553_v1 }
 0x2d7   :  { %v508_v53 = vpop.permute.xlu0 %507 }
 0x2d8   :  { %3123 = vmatmul.mubr.msk.f32.vlgmr.msra.gmra.mxu0 %vm21_vm1, %v508_v53 }
 0x2d9   :  { %3126 = vmatpush3.msra.mxu0 %v3609_v6  ;;  %3133 = vmatprep.mubr.msk.f32.mxu0 %vm3554_vm0, %v3553_v1 }
 0x2da   :  { %3127 = vmatprep.subr.mxu0 %v3553_v1 }
 0x2db   :  { %3128 = vmatpush3.msra.mxu0 %v3616_v7 }
 0x2dc   :  { %3129 = vmatprep.subr.mxu0 %v3553_v1 }
 0x2dd   :  { %3130 = vmatpush3.msra.mxu0 %v3625_v8 }
 0x2de   :  { %3131 = vmatprep.subr.mxu0 %v3553_v1 }
 0x2df   :  { %3132 = vmatpush3.msra.mxu0 %v3632_v9 }
 0x2e0   :  { %3136 = vmatprep.subr.mxu0 %v3553_v1 }
 0x331   :  { %v299_v54 = vpop.f32.mrf.mxu1 }
 0x333   :  { %v3054_v55 = vpop.f32.mrf.mxu1 }
 0x398   :  { %v577_v56 = vpop.f32.mrf.mxu0 }
 0x399   :  { %v581_v57 = vadd.f32 %v577_v56, %v299_v54  ;;  %v99_v54 = vld [vmem:[%s4378_s1 + $0x18] sm:$0xff] }
 0x39a   :  { %v3124_v58 = vpop.f32.mrf.mxu0 }
 0x39b   :  { %v2775_v59 = vmul.f32 -1.442695, %v581_v57 }
 0x39d   :  { %3425 = vpow2.f32 %v2775_v59 }
 0x3aa   :  { %v3426_v60 = vpop.eup %3425 }
 0x3ab   :  { %v585_v61 = vadd.f32 1.0, %v3426_v60 }
 0x3ad   :  { %3427 = vrcp.f32 %v585_v61 }
 0x3ba   :  { %v3428_v62 = vpop.eup %3427 }
 0x3bb   :  { %v588_v63 = vmul.f32 2.0, %v3428_v62  ;;  %v590_v5 = vmul.f32 %v3428_v62, %v3659_v28 }
 0x3bd   :  { %v2776_v0 = vadd.f32 -1.0, %v588_v63 }
 0x3bf   :  { %592 = vrot.lane.b32.xlu1 %v2776_v0, %s3555_s4 }
 0x431   :  { %v593_v2 = vpop.permute.xlu1 %592 }
 0x432   :  { %v595_v3 = vmul.f32 %v3428_v62, %v593_v2 }
 0x434   :  { %597 = vrot.lane.b32.xlu0 %v595_v3, %s3556_s5 }
 0x438   :  { %119 = vperm.xlu0 %3378, %v97_v4  }
 0x4a6   :  { %v598_v10 = vpop.permute.xlu0 %597 }
 0x4a7   :  { %v600_v11 = vadd.f32 %v598_v10, %v590_v5 }
 0x4a9   :  { %3429 = vtanh.f32 %v600_v11 }
 0x4b3   :  { %v120_v12 = vpop.permute.xlu0 %119 }
 0x4b4   :  { %vm167_vm3 = vcmp.eq.s32.totalorder %v3732_v50, %v120_v12 }
 0x4b5   :  { %3056 = vmatmul.mubr.msk.f32.gmra.mxu1 %vm167_vm3, %v3558_v52 }
 0x4b6   :  { %v3430_v13 = vpop.eup %3429  ;;  %3058 = vmatprep.mubr.msk.f32.mxu1 %vm3554_vm0, %v3553_v1 }
 0x4b7   :  { %603 = vrot.lane.b32.xlu1 %v3430_v13, %s3555_s4 }
 0x529   :  { %v604_v14 = vpop.permute.xlu1 %603 }
 0x52a   :  { %v3768_v15 = vmul.f32 %v3428_v62, %v604_v14 }
 0x52c   :  { %623 = vrot.lane.b32.xlu1 %v3768_v15, %s3556_s5 }
 0x575   :  { %v304_v16 = vpop.f32.mrf.mxu1 }
 0x577   :  { %v3057_v17 = vpop.f32.mrf.mxu1 }
 0x59e   :  { %v624_v18 = vpop.permute.xlu1 %623 }
 0x59f   :  { %3134 = vmatmul.mubr.msk.f32.vlgmr.msra.gmra.mxu0 %vm21_vm1, %v624_v18  ;;  %v100_v18 = vld [vmem:[%s4378_s1 + $0x20] sm:$0xff] }
 0x5a0   :  { %3137 = vmatpush3.msra.mxu0 %v3609_v6  ;;  %3144 = vmatprep.mubr.msk.f32.mxu0 %vm3554_vm0, %v3553_v1 }
 0x5a1   :  { %3138 = vmatprep.subr.mxu0 %v3553_v1 }
 0x5a2   :  { %3139 = vmatpush3.msra.mxu0 %v3616_v7 }
 0x5a3   :  { %3140 = vmatprep.subr.mxu0 %v3553_v1 }
 0x5a4   :  { %3141 = vmatpush3.msra.mxu0 %v3625_v8 }
 0x5a5   :  { %3142 = vmatprep.subr.mxu0 %v3553_v1 }
 0x5a6   :  { %3143 = vmatpush3.msra.mxu0 %v3632_v9 }
 0x5a7   :  { %3147 = vmatprep.subr.mxu0 %v3553_v1 }
 0x65f   :  { %v693_v19 = vpop.f32.mrf.mxu0 }
 0x660   :  { %v697_v20 = vadd.f32 %v693_v19, %v304_v16 }
 0x661   :  { %v3135_v21 = vpop.f32.mrf.mxu0 }
 0x662   :  { %v2779_v22 = vmul.f32 -1.442695, %v697_v20 }
 0x664   :  { %3431 = vpow2.f32 %v2779_v22 }
 0x671   :  { %v3432_v23 = vpop.eup %3431 }
 0x672   :  { %v701_v24 = vadd.f32 1.0, %v3432_v23 }
 0x674   :  { %3433 = vrcp.f32 %v701_v24 }
 0x681   :  { %v3434_v25 = vpop.eup %3433 }
 0x682   :  { %v704_v26 = vmul.f32 2.0, %v3434_v25  ;;  %v706_v31 = vmul.f32 %v3434_v25, %v600_v11 }
 0x684   :  { %v2780_v27 = vadd.f32 -1.0, %v704_v26 }
 0x686   :  { %708 = vrot.lane.b32.xlu1 %v2780_v27, %s3555_s4 }
 0x6f8   :  { %v709_v28 = vpop.permute.xlu1 %708 }
 0x6f9   :  { %v711_v29 = vmul.f32 %v3434_v25, %v709_v28 }
 0x6fb   :  { %713 = vrot.lane.b32.xlu0 %v711_v29, %s3556_s5 }
 0x6ff   :  { %122 = vperm.xlu0 %3378, %v98_v30  }
 0x76d   :  { %v714_v32 = vpop.permute.xlu0 %713 }
 0x76e   :  { %v716_v33 = vadd.f32 %v714_v32, %v706_v31 }
 0x770   :  { %3435 = vtanh.f32 %v716_v33 }
 0x77a   :  { %v123_v34 = vpop.permute.xlu0 %122 }
 0x77b   :  { %vm168_vm4 = vcmp.eq.s32.totalorder %v3732_v50, %v123_v34 }
 0x77c   :  { %3059 = vmatmul.mubr.msk.f32.gmra.mxu1 %vm168_vm4, %v3558_v52 }
 0x77d   :  { %v3436_v35 = vpop.eup %3435  ;;  %3061 = vmatprep.mubr.msk.f32.mxu1 %vm3554_vm0, %v3553_v1 }
 0x77e   :  { %719 = vrot.lane.b32.xlu1 %v3436_v35, %s3555_s4 }
 0x7f0   :  { %v720_v36 = vpop.permute.xlu1 %719 }
 0x7f1   :  { %v3793_v37 = vmul.f32 %v3434_v25, %v720_v36 }
 0x7f3   :  { %739 = vrot.lane.b32.xlu1 %v3793_v37, %s3556_s5 }
 0x83c   :  { %v309_v38 = vpop.f32.mrf.mxu1 }
 0x83e   :  { %v3060_v39 = vpop.f32.mrf.mxu1 }
 0x865   :  { %v740_v40 = vpop.permute.xlu1 %739 }
 0x866   :  { %3145 = vmatmul.mubr.msk.f32.vlgmr.msra.gmra.mxu0 %vm21_vm1, %v740_v40 }
 0x867   :  { %3148 = vmatpush3.msra.mxu0 %v3609_v6  ;;  %3155 = vmatprep.mubr.msk.f32.mxu0 %vm3554_vm0, %v3553_v1 }
 0x868   :  { %3149 = vmatprep.subr.mxu0 %v3553_v1 }
 0x869   :  { %3150 = vmatpush3.msra.mxu0 %v3616_v7 }
 0x86a   :  { %3151 = vmatprep.subr.mxu0 %v3553_v1 }
 0x86b   :  { %3152 = vmatpush3.msra.mxu0 %v3625_v8 }
 0x86c   :  { %3153 = vmatprep.subr.mxu0 %v3553_v1 }
 0x86d   :  { %3154 = vmatpush3.msra.mxu0 %v3632_v9 }
 0x86e   :  { %3158 = vmatprep.subr.mxu0 %v3553_v1 }
 0x926   :  { %v809_v41 = vpop.f32.mrf.mxu0 }
 0x927   :  { %v813_v42 = vadd.f32 %v809_v41, %v309_v38  ;;  %v101_v41 = vld [vmem:[%s4378_s1 + $0x28] sm:$0xff] }
 0x928   :  { %v3146_v43 = vpop.f32.mrf.mxu0 }
 0x929   :  { %v2783_v44 = vmul.f32 -1.442695, %v813_v42 }
 0x92b   :  { %3437 = vpow2.f32 %v2783_v44 }
 0x938   :  { %v3438_v45 = vpop.eup %3437 }
 0x939   :  { %v817_v46 = vadd.f32 1.0, %v3438_v45 }
 0x93b   :  { %3439 = vrcp.f32 %v817_v46 }
 0x948   :  { %v3440_v47 = vpop.eup %3439 }
 0x949   :  { %v820_v48 = vmul.f32 2.0, %v3440_v47  ;;  %v822_v55 = vmul.f32 %v3440_v47, %v716_v33 }
 0x94b   :  { %v2784_v49 = vadd.f32 -1.0, %v820_v48 }
 0x94d   :  { %824 = vrot.lane.b32.xlu0 %v2784_v49, %s3555_s4 }
 0x9bf   :  { %v825_v51 = vpop.permute.xlu0 %824 }
 0x9c0   :  { %v827_v53 = vmul.f32 %v3440_v47, %v825_v51 }
 0x9c2   :  { %829 = vrot.lane.b32.xlu1 %v827_v53, %s3556_s5 }
 0x9c6   :  { %125 = vperm.xlu1 %3377, %v99_v54  }
 0xa34   :  { %v830_v56 = vpop.permute.xlu1 %829 }
 0xa35   :  { %v832_v57 = vadd.f32 %v830_v56, %v822_v55 }
 0xa37   :  { %3441 = vtanh.f32 %v832_v57 }
 0xa41   :  { %v126_v58 = vpop.permute.xlu1 %125 }
 0xa42   :  { %vm169_vm5 = vcmp.eq.s32.totalorder %v3732_v50, %v126_v58 }
 0xa43   :  { %3062 = vmatmul.mubr.msk.f32.gmra.mxu1 %vm169_vm5, %v3558_v52 }
 0xa44   :  { %v3442_v59 = vpop.eup %3441  ;;  %3064 = vmatprep.mubr.msk.f32.mxu1 %vm3554_vm0, %v3553_v1 }
 0xa45   :  { %835 = vrot.lane.b32.xlu0 %v3442_v59, %s3555_s4 }
 0xab7   :  { %v836_v60 = vpop.permute.xlu0 %835 }
 0xab8   :  { %v3818_v61 = vmul.f32 %v3440_v47, %v836_v60 }
 0xaba   :  { %855 = vrot.lane.b32.xlu0 %v3818_v61, %s3556_s5 }
 0xb03   :  { %v314_v62 = vpop.f32.mrf.mxu1 }
 0xb05   :  { %v3063_v63 = vpop.f32.mrf.mxu1 }
 0xb2c   :  { %v856_v0 = vpop.permute.xlu0 %855 }
 0xb2d   :  { %3156 = vmatmul.mubr.msk.f32.vlgmr.msra.gmra.mxu0 %vm21_vm1, %v856_v0 }
 0xb2e   :  { %3159 = vmatpush3.msra.mxu0 %v3609_v6  ;;  %3166 = vmatprep.mubr.msk.f32.mxu0 %vm3554_vm0, %v3553_v1 }
 0xb2f   :  { %3160 = vmatprep.subr.mxu0 %v3553_v1 }
 0xb30   :  { %3161 = vmatpush3.msra.mxu0 %v3616_v7 }
 0xb31   :  { %3162 = vmatprep.subr.mxu0 %v3553_v1 }
 0xb32   :  { %3163 = vmatpush3.msra.mxu0 %v3625_v8 }
 0xb33   :  { %3164 = vmatprep.subr.mxu0 %v3553_v1 }
 0xb34   :  { %3165 = vmatpush3.msra.mxu0 %v3632_v9 }
 0xb35   :  { %3169 = vmatprep.subr.mxu0 %v3553_v1 }
 0xbed   :  { %v925_v2 = vpop.f32.mrf.mxu0 }
 0xbee   :  { %v929_v3 = vadd.f32 %v925_v2, %v314_v62 }
 0xbef   :  { %v3157_v4 = vpop.f32.mrf.mxu0 }
 0xbf0   :  { %v2787_v5 = vmul.f32 -1.442695, %v929_v3  ;;  %v102_v3 = vld [vmem:[%s4378_s1 + $0x30] sm:$0xff] }
 0xbf2   :  { %3443 = vpow2.f32 %v2787_v5 }
 0xbff   :  { %v3444_v10 = vpop.eup %3443 }
 0xc00   :  { %v933_v11 = vadd.f32 1.0, %v3444_v10 }
 0xc02   :  { %3445 = vrcp.f32 %v933_v11 }
 0xc0f   :  { %v3446_v12 = vpop.eup %3445 }
 0xc10   :  { %v936_v13 = vmul.f32 2.0, %v3446_v12  ;;  %v938_v19 = vmul.f32 %v3446_v12, %v832_v57 }
 0xc12   :  { %v2788_v14 = vadd.f32 -1.0, %v936_v13 }
 0xc14   :  { %940 = vrot.lane.b32.xlu1 %v2788_v14, %s3555_s4 }
 0xc86   :  { %v941_v16 = vpop.permute.xlu1 %940 }
 0xc87   :  { %v943_v17 = vmul.f32 %v3446_v12, %v941_v16 }
 0xc89   :  { %945 = vrot.lane.b32.xlu0 %v943_v17, %s3556_s5 }
 0xc8d   :  { %128 = vperm.xlu0 %3378, %v100_v18  }
 0xcfb   :  { %v946_v20 = vpop.permute.xlu0 %945 }
 0xcfc   :  { %v948_v21 = vadd.f32 %v946_v20, %v938_v19 }
 0xcfe   :  { %3447 = vtanh.f32 %v948_v21 }
 0xd08   :  { %v129_v22 = vpop.permute.xlu0 %128 }
 0xd09   :  { %vm170_vm6 = vcmp.eq.s32.totalorder %v3732_v50, %v129_v22 }
 0xd0a   :  { %3065 = vmatmul.mubr.msk.f32.gmra.mxu1 %vm170_vm6, %v3558_v52 }
 0xd0b   :  { %v3448_v23 = vpop.eup %3447  ;;  %3067 = vmatprep.mubr.msk.f32.mxu1 %vm3554_vm0, %v3553_v1 }
 0xd0c   :  { %951 = vrot.lane.b32.xlu1 %v3448_v23, %s3555_s4 }
 0xd7e   :  { %v952_v24 = vpop.permute.xlu1 %951 }
 0xd7f   :  { %v3843_v25 = vmul.f32 %v3446_v12, %v952_v24 }
 0xd81   :  { %971 = vrot.lane.b32.xlu1 %v3843_v25, %s3556_s5 }
 0xdca   :  { %v319_v26 = vpop.f32.mrf.mxu1 }
 0xdcc   :  { %v3066_v27 = vpop.f32.mrf.mxu1 }
 0xdf3   :  { %v972_v28 = vpop.permute.xlu1 %971 }
 0xdf4   :  { %3167 = vmatmul.mubr.msk.f32.vlgmr.msra.gmra.mxu0 %vm21_vm1, %v972_v28 }
 0xdf5   :  { %3170 = vmatpush3.msra.mxu0 %v3609_v6  ;;  %3177 = vmatprep.mubr.msk.f32.mxu0 %vm3554_vm0, %v3553_v1 }
 0xdf6   :  { %3171 = vmatprep.subr.mxu0 %v3553_v1 }
 0xdf7   :  { %3172 = vmatpush3.msra.mxu0 %v3616_v7 }
 0xdf8   :  { %3173 = vmatprep.subr.mxu0 %v3553_v1 }
 0xdf9   :  { %3174 = vmatpush3.msra.mxu0 %v3625_v8 }
 0xdfa   :  { %3175 = vmatprep.subr.mxu0 %v3553_v1 }
 0xdfb   :  { %3176 = vmatpush3.msra.mxu0 %v3632_v9 }
 0xdfc   :  { %3180 = vmatprep.subr.mxu0 %v3553_v1 }
 0xeb4   :  { %v1041_v29 = vpop.f32.mrf.mxu0 }
 0xeb5   :  { %v1045_v30 = vadd.f32 %v1041_v29, %v319_v26 }
 0xeb6   :  { %v3168_v31 = vpop.f32.mrf.mxu0 }
 0xeb7   :  { %v2791_v32 = vmul.f32 -1.442695, %v1045_v30  ;;  %v103_v31 = vld [vmem:[%s4378_s1 + $0x38] sm:$0xff] }
 0xeb9   :  { %3449 = vpow2.f32 %v2791_v32 }
 0xec6   :  { %v3450_v33 = vpop.eup %3449 }
 0xec7   :  { %v1049_v34 = vadd.f32 1.0, %v3450_v33 }
 0xec9   :  { %3451 = vrcp.f32 %v1049_v34 }
 0xed6   :  { %v3452_v35 = vpop.eup %3451 }
 0xed7   :  { %v1052_v36 = vmul.f32 2.0, %v3452_v35  ;;  %v1054_v42 = vmul.f32 %v3452_v35, %v948_v21 }
 0xed9   :  { %v2792_v38 = vadd.f32 -1.0, %v1052_v36 }
 0xedb   :  { %1056 = vrot.lane.b32.xlu0 %v2792_v38, %s3555_s4 }
 0xf4d   :  { %v1057_v39 = vpop.permute.xlu0 %1056 }
 0xf4e   :  { %v1059_v40 = vmul.f32 %v3452_v35, %v1057_v39 }
 0xf50   :  { %1061 = vrot.lane.b32.xlu1 %v1059_v40, %s3556_s5 }
 0xf54   :  { %131 = vperm.xlu1 %3377, %v101_v41  }
 0xfc2   :  { %v1062_v43 = vpop.permute.xlu1 %1061 }
 0xfc3   :  { %v1064_v44 = vadd.f32 %v1062_v43, %v1054_v42 }
 0xfc5   :  { %3453 = vtanh.f32 %v1064_v44 }
 0xfcf   :  { %v132_v45 = vpop.permute.xlu1 %131 }
 0xfd0   :  { %vm171_vm7 = vcmp.eq.s32.totalorder %v3732_v50, %v132_v45 }
 0xfd1   :  { %3068 = vmatmul.mubr.msk.f32.gmra.mxu1 %vm171_vm7, %v3558_v52 }
 0xfd2   :  { %v3454_v46 = vpop.eup %3453  ;;  %3070 = vmatprep.mubr.msk.f32.mxu1 %vm3554_vm0, %v3553_v1 }
 0xfd3   :  { %1067 = vrot.lane.b32.xlu0 %v3454_v46, %s3555_s4 }
0x1045   :  { %v1068_v47 = vpop.permute.xlu0 %1067 }
0x1046   :  { %v3868_v48 = vmul.f32 %v3452_v35, %v1068_v47 }
0x1048   :  { %1087 = vrot.lane.b32.xlu0 %v3868_v48, %s3556_s5 }
0x1091   :  { %v324_v49 = vpop.f32.mrf.mxu1 }
0x1093   :  { %v3069_v51 = vpop.f32.mrf.mxu1 }
0x10ba   :  { %v1088_v53 = vpop.permute.xlu0 %1087 }
0x10bb   :  { %3178 = vmatmul.mubr.msk.f32.vlgmr.msra.gmra.mxu0 %vm21_vm1, %v1088_v53 }
0x10bc   :  { %3181 = vmatpush3.msra.mxu0 %v3609_v6  ;;  %3188 = vmatprep.mubr.msk.f32.mxu0 %vm3554_vm0, %v3553_v1 }
0x10bd   :  { %3182 = vmatprep.subr.mxu0 %v3553_v1 }
0x10be   :  { %3183 = vmatpush3.msra.mxu0 %v3616_v7 }
0x10bf   :  { %3184 = vmatprep.subr.mxu0 %v3553_v1 }
0x10c0   :  { %3185 = vmatpush3.msra.mxu0 %v3625_v8 }
0x10c1   :  { %3186 = vmatprep.subr.mxu0 %v3553_v1 }
0x10c2   :  { %3187 = vmatpush3.msra.mxu0 %v3632_v9 }
0x10c3   :  { %3191 = vmatprep.subr.mxu0 %v3553_v1 }
0x117b   :  { %v1157_v54 = vpop.f32.mrf.mxu0 }
0x117c   :  { %v1161_v55 = vadd.f32 %v1157_v54, %v324_v49 }
0x117d   :  { %v3179_v56 = vpop.f32.mrf.mxu0 }
0x117e   :  { %v2795_v57 = vmul.f32 -1.442695, %v1161_v55 }
0x1180   :  { %3455 = vpow2.f32 %v2795_v57  ;;  %v104_v57 = vld [vmem:[%s4378_s1 + $0x40] sm:$0xff] }
0x118d   :  { %v3456_v58 = vpop.eup %3455 }
0x118e   :  { %v1165_v59 = vadd.f32 1.0, %v3456_v58 }
0x1190   :  { %3457 = vrcp.f32 %v1165_v59 }
0x119d   :  { %v3458_v60 = vpop.eup %3457 }
0x119e   :  { %v1168_v62 = vmul.f32 2.0, %v3458_v60  ;;  %v1170_v4 = vmul.f32 %v3458_v60, %v1064_v44 }
0x11a0   :  { %v2796_v63 = vadd.f32 -1.0, %v1168_v62 }
0x11a2   :  { %1172 = vrot.lane.b32.xlu1 %v2796_v63, %s3555_s4 }
0x1214   :  { %v1173_v0 = vpop.permute.xlu1 %1172 }
0x1215   :  { %v1175_v2 = vmul.f32 %v3458_v60, %v1173_v0 }
0x1217   :  { %1177 = vrot.lane.b32.xlu0 %v1175_v2, %s3556_s5 }
0x121b   :  { %134 = vperm.xlu0 %3378, %v102_v3  }
0x1289   :  { %v1178_v5 = vpop.permute.xlu0 %1177 }
0x128a   :  { %v1180_v10 = vadd.f32 %v1178_v5, %v1170_v4 }
0x128c   :  { %3459 = vtanh.f32 %v1180_v10 }
0x1296   :  { %v135_v11 = vpop.permute.xlu0 %134 }
0x1297   :  { %vm172_vm8 = vcmp.eq.s32.totalorder %v3732_v50, %v135_v11 }
0x1298   :  { %3071 = vmatmul.mubr.msk.f32.gmra.mxu1 %vm172_vm8, %v3558_v52 }
0x1299   :  { %v3460_v12 = vpop.eup %3459  ;;  %3073 = vmatprep.mubr.msk.f32.mxu1 %vm3554_vm0, %v3553_v1 }
0x129a   :  { %1183 = vrot.lane.b32.xlu1 %v3460_v12, %s3555_s4 }
0x130c   :  { %v1184_v13 = vpop.permute.xlu1 %1183 }
0x130d   :  { %v3893_v14 = vmul.f32 %v3458_v60, %v1184_v13 }
0x130f   :  { %1203 = vrot.lane.b32.xlu1 %v3893_v14, %s3556_s5 }
0x1358   :  { %v329_v16 = vpop.f32.mrf.mxu1 }
0x135a   :  { %v3072_v17 = vpop.f32.mrf.mxu1 }
0x1381   :  { %v1204_v18 = vpop.permute.xlu1 %1203 }
0x1382   :  { %3189 = vmatmul.mubr.msk.f32.vlgmr.msra.gmra.mxu0 %vm21_vm1, %v1204_v18 }
0x1383   :  { %3192 = vmatpush3.msra.mxu0 %v3609_v6  ;;  %3199 = vmatprep.mubr.msk.f32.mxu0 %vm3554_vm0, %v3553_v1 }
0x1384   :  { %3193 = vmatprep.subr.mxu0 %v3553_v1 }
0x1385   :  { %3194 = vmatpush3.msra.mxu0 %v3616_v7 }
0x1386   :  { %3195 = vmatprep.subr.mxu0 %v3553_v1 }
0x1387   :  { %3196 = vmatpush3.msra.mxu0 %v3625_v8 }
0x1388   :  { %3197 = vmatprep.subr.mxu0 %v3553_v1 }
0x1389   :  { %3198 = vmatpush3.msra.mxu0 %v3632_v9 }
0x138a   :  { %3202 = vmatprep.subr.mxu0 %v3553_v1 }
0x1442   :  { %v1273_v19 = vpop.f32.mrf.mxu0 }
0x1443   :  { %v1277_v20 = vadd.f32 %v1273_v19, %v329_v16 }
0x1444   :  { %v3190_v21 = vpop.f32.mrf.mxu0 }
0x1445   :  { %v2799_v22 = vmul.f32 -1.442695, %v1277_v20  ;;  %v105_v20 = vld [vmem:[%s4378_s1 + $0x48] sm:$0xff] }
0x1447   :  { %3461 = vpow2.f32 %v2799_v22 }
0x1454   :  { %v3462_v23 = vpop.eup %3461 }
0x1455   :  { %v1281_v24 = vadd.f32 1.0, %v3462_v23 }
0x1457   :  { %3463 = vrcp.f32 %v1281_v24 }
0x1464   :  { %v3464_v26 = vpop.eup %3463 }
0x1465   :  { %v1284_v27 = vmul.f32 2.0, %v3464_v26  ;;  %v1286_v32 = vmul.f32 %v3464_v26, %v1180_v10 }
0x1467   :  { %v2800_v28 = vadd.f32 -1.0, %v1284_v27 }
0x1469   :  { %1288 = vrot.lane.b32.xlu0 %v2800_v28, %s3555_s4 }
0x14db   :  { %v1289_v29 = vpop.permute.xlu0 %1288 }
0x14dc   :  { %v1291_v30 = vmul.f32 %v3464_v26, %v1289_v29 }
0x14de   :  { %1293 = vrot.lane.b32.xlu1 %v1291_v30, %s3556_s5 }
0x14e2   :  { %137 = vperm.xlu1 %3377, %v103_v31  }
0x1550   :  { %v1294_v33 = vpop.permute.xlu1 %1293 }
0x1551   :  { %v1296_v34 = vadd.f32 %v1294_v33, %v1286_v32  ;;  %v3976_v32 = vld [vmem:[%s4379_s2 + $0x38] sm:$0xff]  ;;  %v3985_v33 = vld [vmem:[%s4379_s2 + $0x30] sm:$0xff] }
0x1553   :  { %3465 = vtanh.f32 %v1296_v34 }
0x155d   :  { %v138_v35 = vpop.permute.xlu1 %137 }
0x155e   :  { %vm173_vm9 = vcmp.eq.s32.totalorder %v3732_v50, %v138_v35 }
0x155f   :  { %3074 = vmatmul.mubr.msk.f32.gmra.mxu1 %vm173_vm9, %v3558_v52 }
0x1560   :  { %v3466_v36 = vpop.eup %3465  ;;  %3076 = vmatprep.mubr.msk.f32.mxu1 %vm3554_vm0, %v3553_v1 }
0x1561   :  { %1299 = vrot.lane.b32.xlu0 %v3466_v36, %s3555_s4 }
0x15d3   :  { %v1300_v38 = vpop.permute.xlu0 %1299 }
0x15d4   :  { %v3918_v39 = vmul.f32 %v3464_v26, %v1300_v38 }
0x15d6   :  { %1319 = vrot.lane.b32.xlu0 %v3918_v39, %s3556_s5 }
0x161f   :  { %v334_v40 = vpop.f32.mrf.mxu1 }
0x1621   :  { %v3075_v41 = vpop.f32.mrf.mxu1 }
0x1648   :  { %v1320_v42 = vpop.permute.xlu0 %1319 }
0x1649   :  { %3200 = vmatmul.mubr.msk.f32.vlgmr.msra.gmra.mxu0 %vm21_vm1, %v1320_v42 }
0x164a   :  { %3203 = vmatpush3.msra.mxu0 %v3609_v6  ;;  %3210 = vmatprep.mubr.msk.f32.mxu0 %vm3554_vm0, %v3553_v1 }
0x164b   :  { %3204 = vmatprep.subr.mxu0 %v3553_v1 }
0x164c   :  { %3205 = vmatpush3.msra.mxu0 %v3616_v7 }
0x164d   :  { %3206 = vmatprep.subr.mxu0 %v3553_v1 }
0x164e   :  { %3207 = vmatpush3.msra.mxu0 %v3625_v8 }
0x164f   :  { %3208 = vmatprep.subr.mxu0 %v3553_v1 }
0x1650   :  { %3209 = vmatpush3.msra.mxu0 %v3632_v9 }
0x1651   :  { %3213 = vmatprep.subr.mxu0 %v3553_v1 }
0x1709   :  { %v1389_v43 = vpop.f32.mrf.mxu0 }
0x170a   :  { %v1393_v44 = vadd.f32 %v1389_v43, %v334_v40 }
0x170b   :  { %v3201_v45 = vpop.f32.mrf.mxu0 }
0x170c   :  { %v2803_v46 = vmul.f32 -1.442695, %v1393_v44 }
0x170e   :  { %3467 = vpow2.f32 %v2803_v46 }
0x171b   :  { %v3468_v47 = vpop.eup %3467 }
0x171c   :  { %v1397_v49 = vadd.f32 1.0, %v3468_v47 }
0x171e   :  { %3469 = vrcp.f32 %v1397_v49  ;;  %v108_v49 = vld [vmem:[%s4378_s1 + $0x60] sm:$0xff] }
0x172b   :  { %v3470_v51 = vpop.eup %3469 }
0x172c   :  { %v1400_v53 = vmul.f32 2.0, %v3470_v51  ;;  %v1402_v58 = vmul.f32 %v3470_v51, %v1296_v34  ;;  %v3992_v34 = vld [vmem:[%s4379_s2 + $0x28] sm:$0xff] }
0x172e   :  { %v2804_v54 = vadd.f32 -1.0, %v1400_v53  ;;  %v112_v53 = vld [vmem:[%s4378_s1 + $0x80] sm:$0xff] }
0x1730   :  { %1404 = vrot.lane.b32.xlu1 %v2804_v54, %s3555_s4 }
0x17a2   :  { %v1405_v55 = vpop.permute.xlu1 %1404 }
0x17a3   :  { %v1407_v56 = vmul.f32 %v3470_v51, %v1405_v55 }
0x17a5   :  { %1409 = vrot.lane.b32.xlu0 %v1407_v56, %s3556_s5 }
0x17a9   :  { %140 = vperm.xlu0 %3378, %v104_v57  }
0x1817   :  { %v1410_v59 = vpop.permute.xlu0 %1409 }
0x1818   :  { %v1412_v60 = vadd.f32 %v1410_v59, %v1402_v58  ;;  %v107_v59 = vld [vmem:[%s4378_s1 + $0x58] sm:$0xff] }
0x181a   :  { %3471 = vtanh.f32 %v1412_v60 }
0x1824   :  { %v141_v62 = vpop.permute.xlu0 %140 }
0x1825   :  { %vm174_vm10 = vcmp.eq.s32.totalorder %v3732_v50, %v141_v62  ;;  %v111_v62 = vld [vmem:[%s4378_s1 + $0x78] sm:$0xff] }
0x1826   :  { %3077 = vmatmul.mubr.msk.f32.gmra.mxu1 %vm174_vm10, %v3558_v52 }
0x1827   :  { %v3472_v63 = vpop.eup %3471  ;;  %3079 = vmatprep.mubr.msk.f32.mxu1 %vm3554_vm0, %v3553_v1 }
0x1828   :  { %1415 = vrot.lane.b32.xlu1 %v3472_v63, %s3555_s4 }
0x189a   :  { %v1416_v0 = vpop.permute.xlu1 %1415 }
0x189b   :  { %v3943_v2 = vmul.f32 %v3470_v51, %v1416_v0  ;;  %v110_v51 = vld [vmem:[%s4378_s1 + $0x70] sm:$0xff] }
0x189d   :  { %1435 = vrot.lane.b32.xlu1 %v3943_v2, %s3556_s5 }
0x18e6   :  { %v339_v3 = vpop.f32.mrf.mxu1 }
0x18e8   :  { %v3078_v4 = vpop.f32.mrf.mxu1 }
0x190f   :  { %v1436_v5 = vpop.permute.xlu1 %1435 }
0x1910   :  { %3211 = vmatmul.mubr.msk.f32.vlgmr.msra.gmra.mxu0 %vm21_vm1, %v1436_v5 }
0x1911   :  { %3214 = vmatpush3.msra.mxu0 %v3609_v6  ;;  %3221 = vmatprep.mubr.msk.f32.mxu0 %vm3554_vm0, %v3553_v1 }
0x1912   :  { %3215 = vmatprep.subr.mxu0 %v3553_v1 }
0x1913   :  { %3216 = vmatpush3.msra.mxu0 %v3616_v7 }
0x1914   :  { %3217 = vmatprep.subr.mxu0 %v3553_v1 }
0x1915   :  { %3218 = vmatpush3.msra.mxu0 %v3625_v8 }
0x1916   :  { %3219 = vmatprep.subr.mxu0 %v3553_v1 }
0x1917   :  { %3220 = vmatpush3.msra.mxu0 %v3632_v9 }
0x1918   :  { %3235 = vmatprep.subr.mxu0 %v3553_v1 }
0x19d0   :  { %v1505_v10 = vpop.f32.mrf.mxu0 }
0x19d1   :  { %v1509_v11 = vadd.f32 %v1505_v10, %v339_v3 }
0x19d2   :  { %v3212_v6 = vpop.f32.mrf.mxu0 }
0x19d3   :  { %v2807_v12 = vmul.f32 -1.442695, %v1509_v11 }
0x19d5   :  { %3473 = vpow2.f32 %v2807_v12 }
0x19e2   :  { %v3474_v13 = vpop.eup %3473 }
0x19e3   :  { %v1513_v16 = vadd.f32 1.0, %v3474_v13 }
0x19e5   :  { %3475 = vrcp.f32 %v1513_v16 }
0x19f2   :  { %v3476_v17 = vpop.eup %3475 }
0x19f3   :  { %v1516_v7 = vmul.f32 2.0, %v3476_v17  ;;  %v1518_v21 = vmul.f32 %v3476_v17, %v1412_v60  ;;  %v109_v60 = vld [vmem:[%s4378_s1 + $0x68] sm:$0xff] }
0x19f5   :  { %v2808_v18 = vadd.f32 -1.0, %v1516_v7 }
0x19f7   :  { %1520 = vrot.lane.b32.xlu0 %v2808_v18, %s3555_s4 }
0x1a69   :  { %v1521_v8 = vpop.permute.xlu0 %1520 }
0x1a6a   :  { %v1523_v19 = vmul.f32 %v3476_v17, %v1521_v8 }
0x1a6c   :  { %1525 = vrot.lane.b32.xlu1 %v1523_v19, %s3556_s5 }
0x1a70   :  { %143 = vperm.xlu1 %3377, %v105_v20  }
0x1ade   :  { %v1526_v22 = vpop.permute.xlu1 %1525 }
0x1adf   :  { %v1528_v23 = vadd.f32 %v1526_v22, %v1518_v21 }
0x1ae1   :  { %3477 = vtanh.f32 %v1528_v23 }
0x1aeb   :  { %v144_v24 = vpop.permute.xlu1 %143 }
0x1aec   :  { %vm175_vm11 = vcmp.eq.s32.totalorder %v3732_v50, %v144_v24 }
0x1aed   :  { %3080 = vmatmul.mubr.msk.f32.gmra.mxu1 %vm175_vm11, %v3558_v52 }
0x1aee   :  { %v3478_v26 = vpop.eup %3477  ;;  %3082 = vmatprep.mubr.msk.f32.mxu1 %vm3554_vm0, %v3553_v1 }
0x1aef   :  { %1531 = vrot.lane.b32.xlu0 %v3478_v26, %s3555_s4 }
0x1b61   :  { %v1532_v27 = vpop.permute.xlu0 %1531 }
0x1b62   :  { %v3968_v28 = vmul.f32 %v3476_v17, %v1532_v27 }
0x1b64   :  { %1551 = vrot.lane.b32.xlu0 %v3968_v28, %s3556_s5 }
0x1bad   :  { %v344_v29 = vpop.f32.mrf.mxu1 }
0x1baf   :  { %v3081_v30 = vpop.f32.mrf.mxu1 }
0x1bd6   :  { %v1552_v31 = vpop.permute.xlu0 %1551 }
0x1bd7   :  { %3222 = vmatmul.mubr.msk.f32.vlgmr.msra.gmra.mxu0 %vm21_vm1, %v1552_v31 }
0x1bd8   :  { %3236 = vmatpush3.msra.mxu0 %v3976_v32  ;;  %3243 = vmatprep.mubr.msk.f32.mxu0 %vm3554_vm0, %v3553_v1 }
0x1bd9   :  { %3237 = vmatprep.subr.mxu0 %v3553_v1 }
0x1bda   :  { %3238 = vmatpush3.msra.mxu0 %v3985_v33 }
0x1bdb   :  { %3239 = vmatprep.subr.mxu0 %v3553_v1 }
0x1bdc   :  { %3240 = vmatpush3.msra.mxu0 %v3992_v34 }
0x1bdd   :  { %3241 = vmatprep.subr.mxu0 %v3553_v1 }
0x1bde   :  { %3242 = vmatpush3.msra.mxu0 %v3632_v9  ;;  %v106_v9 = vld [vmem:[%s4378_s1 + $0x50] sm:$0xff] }
0x1bdf   :  { %3257 = vmatprep.subr.mxu0 %v3553_v1 }
0x1c97   :  { %v1621_v35 = vpop.f32.mrf.mxu0 }
0x1c98   :  { %v1625_v36 = vadd.f32 %v1621_v35, %v344_v29 }
0x1c99   :  { %v3223_v38 = vpop.f32.mrf.mxu0 }
0x1c9a   :  { %v2811_v40 = vmul.f32 -1.442695, %v1625_v36 }
0x1c9c   :  { %3479 = vpow2.f32 %v2811_v40 }
0x1ca9   :  { %v3480_v41 = vpop.eup %3479 }
0x1caa   :  { %v1629_v42 = vadd.f32 1.0, %v3480_v41 }
0x1cac   :  { %3481 = vrcp.f32 %v1629_v42 }
0x1cb9   :  { %v3482_v43 = vpop.eup %3481 }
0x1cba   :  { %v1632_v44 = vmul.f32 2.0, %v3482_v43  ;;  %v1634_v54 = vmul.f32 %v3482_v43, %v1528_v23 }
0x1cbc   :  { %v2812_v45 = vadd.f32 -1.0, %v1632_v44 }
0x1cbe   :  { %1636 = vrot.lane.b32.xlu1 %v2812_v45, %s3555_s4 }
0x1d30   :  { %v1637_v46 = vpop.permute.xlu1 %1636 }
0x1d31   :  { %v1639_v47 = vmul.f32 %v3482_v43, %v1637_v46 }
0x1d33   :  { %1641 = vrot.lane.b32.xlu0 %v1639_v47, %s3556_s5 }
0x1d37   :  { %146 = vperm.xlu0 %3378, %v106_v9  }
0x1d3b   :  { %152 = vperm.xlu0 %3378, %v108_v49  }
0x1d3f   :  { %158 = vperm.xlu0 %3378, %v110_v51  }
0x1d43   :  { %164 = vperm.xlu0 %3378, %v112_v53  }
0x1da5   :  { %v1642_v55 = vpop.permute.xlu0 %1641 }
0x1da6   :  { %v4012_v56 = vadd.f32 %v1642_v55, %v1634_v54 }
0x1da8   :  { %3483 = vtanh.f32 %v4012_v56 }
0x1db2   :  { %v147_v57 = vpop.permute.xlu0 %146 }
0x1db3   :  { %vm176_vm12 = vcmp.eq.s32.totalorder %v3732_v50, %v147_v57 }
0x1db4   :  { %3083 = vmatmul.mubr.msk.f32.gmra.mxu1 %vm176_vm12, %v3558_v52 }
0x1db5   :  { %v3484_v58 = vpop.eup %3483  ;;  %3085 = vmatprep.mubr.msk.f32.mxu1 %vm3554_vm0, %v3553_v1 }
0x1db6   :  { %1647 = vrot.lane.b32.xlu1 %v3484_v58, %s3555_s4  ;;  %v153_v4 = vpop.permute.xlu0 %152 }
0x1db7   :  { %vm178_vm14 = vcmp.eq.s32.totalorder %v3732_v50, %v153_v4 }
0x1dba   :  { %149 = vperm.xlu1 %3377, %v107_v59   ;;  %v159_v10 = vpop.permute.xlu0 %158 }
0x1dbb   :  { %vm180_vm2 = vcmp.eq.s32.totalorder %v3732_v50, %v159_v10 }
0x1dbe   :  { %155 = vperm.xlu1 %3377, %v109_v60   ;;  %v165_v6 = vpop.permute.xlu0 %164 }
0x1dbf   :  { %vm182_vm4 = vcmp.eq.s32.totalorder %v3732_v50, %v165_v6 }
0x1dc2   :  { %161 = vperm.xlu1 %3377, %v111_v62  }
0x1e28   :  { %v1648_v63 = vpop.permute.xlu1 %1647 }
0x1e29   :  { %v4029_v0 = vmul.f32 %v3482_v43, %v1648_v63 }
0x1e2b   :  { %1667 = vrot.lane.b32.xlu1 %v4029_v0, %s3556_s5 }
0x1e35   :  { %v150_v3 = vpop.permute.xlu1 %149 }
0x1e36   :  { %vm177_vm13 = vcmp.eq.s32.totalorder %v3732_v50, %v150_v3 }
0x1e37   :  { %3086 = vmatmul.mubr.msk.f32.gmra.mxu1 %vm177_vm13, %v3558_v52 }
0x1e38   :  { %3088 = vmatprep.mubr.msk.f32.mxu1 %vm3554_vm0, %v3553_v1 }
0x1e39   :  { %v156_v5 = vpop.permute.xlu1 %155 }
0x1e3a   :  { %vm179_vm15 = vcmp.eq.s32.totalorder %v3732_v50, %v156_v5 }
0x1e3b   :  { %3089 = vmatmul.mubr.msk.f32.gmra.mxu1 %vm178_vm14, %v3558_v52 }
0x1e3c   :  { %3091 = vmatprep.mubr.msk.f32.mxu1 %vm3554_vm0, %v3553_v1 }
0x1e3d   :  { %v162_v11 = vpop.permute.xlu1 %161 }
0x1e3e   :  { %vm181_vm3 = vcmp.eq.s32.totalorder %v3732_v50, %v162_v11  ;;  %v4069_v50 = vld [vmem:[%s4379_s2 + $0x20] sm:$0xff] }
0x1e3f   :  { %3092 = vmatmul.mubr.msk.f32.gmra.mxu1 %vm179_vm15, %v3558_v52 }
0x1e40   :  { %3094 = vmatprep.mubr.msk.f32.mxu1 %vm3554_vm0, %v3553_v1 }
0x1e43   :  { %3095 = vmatmul.mubr.msk.f32.gmra.mxu1 %vm180_vm2, %v3558_v52 }
0x1e44   :  { %3097 = vmatprep.mubr.msk.f32.mxu1 %vm3554_vm0, %v3553_v1 }
0x1e47   :  { %3098 = vmatmul.mubr.msk.f32.gmra.mxu1 %vm181_vm3, %v3558_v52 }
0x1e48   :  { %3100 = vmatprep.mubr.msk.f32.mxu1 %vm3554_vm0, %v3553_v1 }
0x1e4b   :  { %3101 = vmatmul.mubr.msk.f32.gmra.mxu1 %vm182_vm4, %v3558_v52 }
0x1e4c   :  { %3232 = vmatprep.mubr.msk.f32.mxu1 %vm3554_vm0, %v3553_v1 }
0x1e74   :  { %v349_v12 = vpop.f32.mrf.mxu1 }
0x1e76   :  { %v3084_v13 = vpop.f32.mrf.mxu1 }
0x1e9d   :  { %v1668_v16 = vpop.permute.xlu1 %1667 }
0x1e9e   :  { %3233 = vmatmul.mubr.msk.f32.vlgmr.msra.gmra.mxu1 %vm21_vm1, %v1668_v16 }
0x1e9f   :  { %3247 = vmatpush3.msra.mxu1 %v3976_v32  ;;  %3254 = vmatprep.mubr.msk.f32.mxu1 %vm3554_vm0, %v3553_v1 }
0x1ea0   :  { %3248 = vmatprep.subr.mxu1 %v3553_v1 }
0x1ea1   :  { %3249 = vmatpush3.msra.mxu1 %v3985_v33 }
0x1ea2   :  { %3250 = vmatprep.subr.mxu1 %v3553_v1 }
0x1ea3   :  { %3251 = vmatpush3.msra.mxu1 %v3992_v34 }
0x1ea4   :  { %3252 = vmatprep.subr.mxu1 %v3553_v1 }
0x1ea5   :  { %3253 = vmatpush3.msra.mxu1 %v4069_v50 }
0x1ea6   :  { %3268 = vmatprep.subr.mxu1 %v3553_v1 }
0x1ef7   :  { %v354_v52 = vpop.f32.mrf.mxu1 }
0x1ef9   :  { %v3087_v17 = vpop.f32.mrf.mxu1 }
0x1efb   :  { %v4073_v7 = vpop.f32.mrf.mxu1 }
0x1efd   :  { %v3090_v18 = vpop.f32.mrf.mxu1 }
0x1eff   :  { %v4075_v8 = vpop.f32.mrf.mxu1 }
0x1f01   :  { %v3093_v19 = vpop.f32.mrf.mxu1 }
0x1f03   :  { %v4077_v20 = vpop.f32.mrf.mxu1 }
0x1f05   :  { %v3096_v21 = vpop.f32.mrf.mxu1 }
0x1f07   :  { %v4079_v22 = vpop.f32.mrf.mxu1 }
0x1f09   :  { %v3099_v23 = vpop.f32.mrf.mxu1 }
0x1f0b   :  { %v4081_v24 = vpop.f32.mrf.mxu1 }
0x1f0d   :  { %v3102_v26 = vpop.f32.mrf.mxu1 }
0x1f5e   :  { %v1737_v27 = vpop.f32.mrf.mxu1 }
0x1f5f   :  { %v1741_v29 = vadd.f32 %v1737_v27, %v349_v12 }
0x1f60   :  { %v3234_v30 = vpop.f32.mrf.mxu1 }
0x1f61   :  { %v2815_v31 = vmul.f32 -1.442695, %v1741_v29 }
0x1f63   :  { %3485 = vpow2.f32 %v2815_v31 }
0x1f70   :  { %v3486_v35 = vpop.eup %3485 }
0x1f71   :  { %v1745_v36 = vadd.f32 1.0, %v3486_v35 }
0x1f73   :  { %3487 = vrcp.f32 %v1745_v36 }
0x1f80   :  { %v3488_v38 = vpop.eup %3487 }
0x1f81   :  { %v1748_v40 = vmul.f32 2.0, %v3488_v38  ;;  %v1750_v44 = vmul.f32 %v3488_v38, %v4012_v56 }
0x1f83   :  { %v2816_v41 = vadd.f32 -1.0, %v1748_v40 }
0x1f85   :  { %1752 = vrot.lane.b32.xlu0 %v2816_v41, %s3555_s4 }
0x1ff7   :  { %v1753_v42 = vpop.permute.xlu0 %1752 }
0x1ff8   :  { %v1755_v43 = vmul.f32 %v3488_v38, %v1753_v42 }
0x1ffa   :  { %1757 = vrot.lane.b32.xlu1 %v1755_v43, %s3556_s5 }
0x206c   :  { %v1758_v45 = vpop.permute.xlu1 %1757 }
0x206d   :  { %v1760_v46 = vadd.f32 %v1758_v45, %v1750_v44 }
0x206f   :  { %3489 = vtanh.f32 %v1760_v46 }
0x207c   :  { %v3490_v47 = vpop.eup %3489 }
0x207d   :  { %1763 = vrot.lane.b32.xlu0 %v3490_v47, %s3555_s4 }
0x20ef   :  { %v1764_v9 = vpop.permute.xlu0 %1763 }
0x20f0   :  { %v4087_v49 = vmul.f32 %v3488_v38, %v1764_v9 }
0x20f2   :  { %1783 = vrot.lane.b32.xlu1 %v4087_v49, %s3556_s5 }
0x2164   :  { %v1784_v51 = vpop.permute.xlu1 %1783 }
0x2165   :  { %3244 = vmatmul.mubr.msk.f32.vlgmr.msra.gmra.mxu0 %vm21_vm1, %v1784_v51 }
0x2166   :  { %3258 = vmatpush3.msra.mxu0 %v3976_v32  ;;  %3265 = vmatprep.mubr.msk.f32.mxu0 %vm3554_vm0, %v3553_v1 }
0x2167   :  { %3259 = vmatprep.subr.mxu0 %v3553_v1 }
0x2168   :  { %3260 = vmatpush3.msra.mxu0 %v3985_v33 }
0x2169   :  { %3261 = vmatprep.subr.mxu0 %v3553_v1 }
0x216a   :  { %3262 = vmatpush3.msra.mxu0 %v3992_v34 }
0x216b   :  { %3263 = vmatprep.subr.mxu0 %v3553_v1 }
0x216c   :  { %3264 = vmatpush3.msra.mxu0 %v4069_v50 }
0x216d   :  { %3279 = vmatprep.subr.mxu0 %v3553_v1 }
0x2225   :  { %v1853_v53 = vpop.f32.mrf.mxu0 }
0x2226   :  { %v1857_v54 = vadd.f32 %v1853_v53, %v354_v52 }
0x2227   :  { %v3245_v55 = vpop.f32.mrf.mxu0 }
0x2228   :  { %v2819_v56 = vmul.f32 -1.442695, %v1857_v54 }
0x222a   :  { %3491 = vpow2.f32 %v2819_v56 }
0x2237   :  { %v3492_v57 = vpop.eup %3491 }
0x2238   :  { %v1861_v58 = vadd.f32 1.0, %v3492_v57 }
0x223a   :  { %3493 = vrcp.f32 %v1861_v58 }
0x2247   :  { %v3494_v59 = vpop.eup %3493 }
0x2248   :  { %v1864_v60 = vmul.f32 2.0, %v3494_v59  ;;  %v1866_v4 = vmul.f32 %v3494_v59, %v1760_v46 }
0x224a   :  { %v2820_v62 = vadd.f32 -1.0, %v1864_v60 }
0x224c   :  { %1868 = vrot.lane.b32.xlu0 %v2820_v62, %s3555_s4 }
0x22be   :  { %v1869_v63 = vpop.permute.xlu0 %1868 }
0x22bf   :  { %v1871_v3 = vmul.f32 %v3494_v59, %v1869_v63 }
0x22c1   :  { %1873 = vrot.lane.b32.xlu1 %v1871_v3, %s3556_s5 }
0x2333   :  { %v1874_v5 = vpop.permute.xlu1 %1873 }
0x2334   :  { %v1876_v10 = vadd.f32 %v1874_v5, %v1866_v4 }
0x2336   :  { %3495 = vtanh.f32 %v1876_v10 }
0x2343   :  { %v3496_v11 = vpop.eup %3495 }
0x2344   :  { %1879 = vrot.lane.b32.xlu0 %v3496_v11, %s3555_s4 }
0x23b6   :  { %v1880_v6 = vpop.permute.xlu0 %1879 }
0x23b7   :  { %v4105_v12 = vmul.f32 %v3494_v59, %v1880_v6 }
0x23b9   :  { %1899 = vrot.lane.b32.xlu1 %v4105_v12, %s3556_s5 }
0x242b   :  { %v1900_v13 = vpop.permute.xlu1 %1899 }
0x242c   :  { %3255 = vmatmul.mubr.msk.f32.vlgmr.msra.gmra.mxu1 %vm21_vm1, %v1900_v13 }
0x242d   :  { %3269 = vmatpush3.msra.mxu1 %v3976_v32  ;;  %3276 = vmatprep.mubr.msk.f32.mxu1 %vm3554_vm0, %v3553_v1 }
0x242e   :  { %3270 = vmatprep.subr.mxu1 %v3553_v1 }
0x242f   :  { %3271 = vmatpush3.msra.mxu1 %v3985_v33 }
0x2430   :  { %3272 = vmatprep.subr.mxu1 %v3553_v1 }
0x2431   :  { %3273 = vmatpush3.msra.mxu1 %v3992_v34 }
0x2432   :  { %3274 = vmatprep.subr.mxu1 %v3553_v1 }
0x2433   :  { %3275 = vmatpush3.msra.mxu1 %v4069_v50 }
0x2434   :  { %3290 = vmatprep.subr.mxu1 %v3553_v1 }
0x24ec   :  { %v1969_v16 = vpop.f32.mrf.mxu1 }
0x24ed   :  { %v1973_v52 = vadd.f32 %v1969_v16, %v4073_v7 }
0x24ee   :  { %v3256_v17 = vpop.f32.mrf.mxu1 }
0x24ef   :  { %v2823_v18 = vmul.f32 -1.442695, %v1973_v52 }
0x24f1   :  { %3497 = vpow2.f32 %v2823_v18 }
0x24fe   :  { %v3498_v19 = vpop.eup %3497 }
0x24ff   :  { %v1977_v21 = vadd.f32 1.0, %v3498_v19 }
0x2501   :  { %3499 = vrcp.f32 %v1977_v21 }
0x250e   :  { %v3500_v23 = vpop.eup %3499 }
0x250f   :  { %v1980_v26 = vmul.f32 2.0, %v3500_v23  ;;  %v1982_v31 = vmul.f32 %v3500_v23, %v1876_v10 }
0x2511   :  { %v2824_v27 = vadd.f32 -1.0, %v1980_v26 }
0x2513   :  { %1984 = vrot.lane.b32.xlu0 %v2824_v27, %s3555_s4 }
0x2585   :  { %v1985_v29 = vpop.permute.xlu0 %1984 }
0x2586   :  { %v1987_v30 = vmul.f32 %v3500_v23, %v1985_v29 }
0x2588   :  { %1989 = vrot.lane.b32.xlu1 %v1987_v30, %s3556_s5 }
0x25fa   :  { %v1990_v35 = vpop.permute.xlu1 %1989 }
0x25fb   :  { %v1992_v36 = vadd.f32 %v1990_v35, %v1982_v31 }
0x25fd   :  { %3501 = vtanh.f32 %v1992_v36 }
0x260a   :  { %v3502_v7 = vpop.eup %3501 }
0x260b   :  { %1995 = vrot.lane.b32.xlu0 %v3502_v7, %s3555_s4 }
0x267d   :  { %v1996_v38 = vpop.permute.xlu0 %1995 }
0x267e   :  { %v4124_v40 = vmul.f32 %v3500_v23, %v1996_v38 }
0x2680   :  { %2015 = vrot.lane.b32.xlu1 %v4124_v40, %s3556_s5 }
0x26f2   :  { %v2016_v41 = vpop.permute.xlu1 %2015 }
0x26f3   :  { %3266 = vmatmul.mubr.msk.f32.vlgmr.msra.gmra.mxu0 %vm21_vm1, %v2016_v41 }
0x26f4   :  { %3280 = vmatpush3.msra.mxu0 %v3976_v32  ;;  %3287 = vmatprep.mubr.msk.f32.mxu0 %vm3554_vm0, %v3553_v1 }
0x26f5   :  { %3281 = vmatprep.subr.mxu0 %v3553_v1 }
0x26f6   :  { %3282 = vmatpush3.msra.mxu0 %v3985_v33 }
0x26f7   :  { %3283 = vmatprep.subr.mxu0 %v3553_v1 }
0x26f8   :  { %3284 = vmatpush3.msra.mxu0 %v3992_v34 }
0x26f9   :  { %3285 = vmatprep.subr.mxu0 %v3553_v1 }
0x26fa   :  { %3286 = vmatpush3.msra.mxu0 %v4069_v50 }
0x26fb   :  { %3301 = vmatprep.subr.mxu0 %v3553_v1 }
0x27b3   :  { %v2085_v42 = vpop.f32.mrf.mxu0 }
0x27b4   :  { %v2089_v43 = vadd.f32 %v2085_v42, %v4075_v8 }
0x27b5   :  { %v3267_v44 = vpop.f32.mrf.mxu0 }
0x27b6   :  { %v2827_v45 = vmul.f32 -1.442695, %v2089_v43 }
0x27b8   :  { %3503 = vpow2.f32 %v2827_v45 }
0x27c5   :  { %v3504_v46 = vpop.eup %3503 }
0x27c6   :  { %v2093_v47 = vadd.f32 1.0, %v3504_v46 }
0x27c8   :  { %3505 = vrcp.f32 %v2093_v47 }
0x27d5   :  { %v3506_v9 = vpop.eup %3505 }
0x27d6   :  { %v2096_v51 = vmul.f32 2.0, %v3506_v9  ;;  %v2098_v56 = vmul.f32 %v3506_v9, %v1992_v36 }
0x27d8   :  { %v2828_v53 = vadd.f32 -1.0, %v2096_v51 }
0x27da   :  { %2100 = vrot.lane.b32.xlu0 %v2828_v53, %s3555_s4 }
0x284c   :  { %v2101_v54 = vpop.permute.xlu0 %2100 }
0x284d   :  { %v2103_v55 = vmul.f32 %v3506_v9, %v2101_v54 }
0x284f   :  { %2105 = vrot.lane.b32.xlu1 %v2103_v55, %s3556_s5 }
0x28c1   :  { %v2106_v57 = vpop.permute.xlu1 %2105 }
0x28c2   :  { %v2108_v58 = vadd.f32 %v2106_v57, %v2098_v56  ;;  %v4189_v57 = vld [vmem:[%s4378_s1 + $0x88] sm:$0xff] }
0x28c3   :  { %vm607_vm5 = vcmp.gt.s32.totalorder %v4189_v57, 0  ;;  %vm839_vm6 = vcmp.gt.s32.totalorder %v4189_v57, 2  ;;  %vm1767_vm7 = vcmp.gt.s32.totalorder %v4189_v57, 10  ;;  %vm1071_vm8 = vcmp.gt.s32.totalorder %v4189_v57, 4 }
0x28c4   :  { %3507 = vtanh.f32 %v2108_v58  ;;  %vm1999_vm9 = vcmp.gt.s32.totalorder %v4189_v57, 12  ;;  %vm1303_vm10 = vcmp.gt.s32.totalorder %v4189_v57, 6  ;;  %vm2231_vm11 = vcmp.gt.s32.totalorder %v4189_v57, 14 }
0x28c5   :  { %vm1535_vm12 = vcmp.gt.s32.totalorder %v4189_v57, 8  ;;  %vm2463_vm13 = vcmp.gt.s32.totalorder %v4189_v57, 16  ;;  %vm723_vm14 = vcmp.gt.s32.totalorder %v4189_v57, 1  ;;  %vm1651_vm15 = vcmp.gt.s32.totalorder %v4189_v57, 9 }
0x28c6   :  { %vm955_vm2 = vcmp.gt.s32.totalorder %v4189_v57, 3  ;;  %vm1883_vm3 = vcmp.gt.s32.totalorder %v4189_v57, 11  ;;  %vm1187_vm4 = vcmp.gt.s32.totalorder %v4189_v57, 5 }
0x28d1   :  { %v3508_v8 = vpop.eup %3507 }
0x28d2   :  { %2111 = vrot.lane.b32.xlu0 %v3508_v8, %s3555_s4 }
0x2944   :  { %v2112_v59 = vpop.permute.xlu0 %2111 }
0x2945   :  { %v4143_v60 = vmul.f32 %v3506_v9, %v2112_v59  ;;  %v2785_v59 = vsel %vm839_vm6, 1.0, %v3553_v1  ;;  %vm1419_vm6 = vcmp.gt.s32.totalorder %v4189_v57, 7 }
0x2947   :  { %2131 = vrot.lane.b32.xlu1 %v4143_v60, %s3556_s5 }
0x29b9   :  { %v2132_v62 = vpop.permute.xlu1 %2131 }
0x29ba   :  { %3277 = vmatmul.mubr.msk.f32.vlgmr.msra.gmra.mxu1 %vm21_vm1, %v2132_v62  ;;  %v2817_v62 = vsel %vm1767_vm7, 1.0, %v3553_v1  ;;  %vm2347_vm7 = vcmp.gt.s32.totalorder %v4189_v57, 15 }
0x29bb   :  { %3291 = vmatpush3.msra.mxu1 %v3976_v32  ;;  %3298 = vmatprep.mubr.msk.f32.mxu1 %vm3554_vm0, %v3553_v1 }
0x29bc   :  { %3292 = vmatprep.subr.mxu1 %v3553_v1 }
0x29bd   :  { %3293 = vmatpush3.msra.mxu1 %v3985_v33 }
0x29be   :  { %3294 = vmatprep.subr.mxu1 %v3553_v1 }
0x29bf   :  { %3295 = vmatpush3.msra.mxu1 %v3992_v34 }
0x29c0   :  { %3296 = vmatprep.subr.mxu1 %v3553_v1 }
0x29c1   :  { %3297 = vmatpush3.msra.mxu1 %v4069_v50 }
0x29c2   :  { %3360 = vmatprep.subr.mxu1 %v3553_v1 }
0x2a7a   :  { %v2201_v63 = vpop.f32.mrf.mxu1 }
0x2a7b   :  { %v2205_v32 = vadd.f32 %v2201_v63, %v4077_v20  ;;  %v3384_v63 = vpack.i.bf16 %v2817_v62, %v2785_v59 }
0x2a7c   :  { %v3278_v3 = vpop.f32.mrf.mxu1 }
0x2a7d   :  { %v2831_v4 = vmul.f32 -1.442695, %v2205_v32  ;;  %v2793_v32 = vsel %vm1071_vm8, 1.0, %v3553_v1  ;;  %v2825_v3 = vsel %vm1999_vm9, 1.0, %v3553_v1 }
0x2a7f   :  { %3509 = vpow2.f32 %v2831_v4  ;;  %v3394_v4 = vpack.i.bf16 %v2825_v3, %v2793_v32 }
0x2a8c   :  { %v3510_v5 = vpop.eup %3509 }
0x2a8d   :  { %v2209_v10 = vadd.f32 1.0, %v3510_v5  ;;  %v2801_v5 = vsel %vm1303_vm10, 1.0, %v3553_v1 }
0x2a8f   :  { %3511 = vrcp.f32 %v2209_v10  ;;  %v2833_v10 = vsel %vm2231_vm11, 1.0, %v3553_v1 }
0x2a9c   :  { %v3512_v33 = vpop.eup %3511 }
0x2a9d   :  { %v2212_v11 = vmul.f32 2.0, %v3512_v33  ;;  %v2214_v50 = vmul.f32 %v3512_v33, %v2108_v58 }
0x2a9f   :  { %v2832_v6 = vadd.f32 -1.0, %v2212_v11  ;;  %v2809_v11 = vsel %vm1535_vm12, 1.0, %v3553_v1 }
0x2aa1   :  { %2216 = vrot.lane.b32.xlu0 %v2832_v6, %s3555_s4  ;;  %v2841_v6 = vsel %vm2463_vm13, 1.0, %v3553_v1 }
0x2b13   :  { %v2217_v34 = vpop.permute.xlu0 %2216 }
0x2b14   :  { %v2219_v13 = vmul.f32 %v3512_v33, %v2217_v34  ;;  %v3414_v34 = vpack.i.bf16 %v2841_v6, %v2809_v11 }
0x2b16   :  { %2221 = vrot.lane.b32.xlu1 %v2219_v13, %s3556_s5 }
0x2b88   :  { %v2222_v16 = vpop.permute.xlu1 %2221 }
0x2b89   :  { %v2224_v52 = vadd.f32 %v2222_v16, %v2214_v50  ;;  %v2781_v50 = vsel %vm723_vm14, 1.0, %v3553_v1  ;;  %v2813_v16 = vsel %vm1651_vm15, 1.0, %v3553_v1 }
0x2b8b   :  { %3513 = vtanh.f32 %v2224_v52 }
0x2b98   :  { %v3514_v20 = vpop.eup %3513 }
0x2b99   :  { %2227 = vrot.lane.b32.xlu0 %v3514_v20, %s3555_s4  ;;  %v3379_v20 = vpack.i.bf16 %v2813_v16, %v2781_v50 }
0x2c0b   :  { %v2228_v17 = vpop.permute.xlu0 %2227 }
0x2c0c   :  { %v4162_v18 = vmul.f32 %v3512_v33, %v2228_v17  ;;  %v3404_v33 = vpack.i.bf16 %v2833_v10, %v2801_v5  ;;  %v2497_v17 = vld [vmem:[%s4379_s2 + $0x58] sm:$0xff] }
0x2c0e   :  { %2247 = vrot.lane.b32.xlu1 %v4162_v18, %s3556_s5 }
0x2c80   :  { %v2248_v19 = vpop.permute.xlu1 %2247 }
0x2c81   :  { %3288 = vmatmul.mubr.msk.f32.vlgmr.msra.gmra.mxu0 %vm21_vm1, %v2248_v19  ;;  %v2789_v19 = vsel %vm955_vm2, 1.0, %v3553_v1 }
0x2c82   :  { %3309 = vmatprep.mubr.msk.f32.mxu0 %vm3554_vm0, %v3553_v1  ;;  %3302 = vmatpush3.msra.mxu0 %v2497_v17 }
0x2c83   :  { %3303 = vmatprep.subr.mxu0 %v3553_v1 }
0x2d41   :  { %v2317_v21 = vpop.f32.mrf.mxu0 }
0x2d42   :  { %v2321_v23 = vadd.f32 %v2317_v21, %v4079_v22  ;;  %v2821_v21 = vsel %vm1883_vm3, 1.0, %v3553_v1 }
0x2d43   :  { %v3289_v26 = vpop.f32.mrf.mxu0 }
0x2d44   :  { %v2835_v27 = vmul.f32 -1.442695, %v2321_v23  ;;  %v2496_v23 = vld [vmem:[%s4379_s2 + $0x50] sm:$0xff]  ;;  %v3389_v26 = vpack.i.bf16 %v2821_v21, %v2789_v19 }
0x2d45   :  { %3304 = vmatpush3.msra.mxu0 %v2496_v23 }
0x2d46   :  { %3515 = vpow2.f32 %v2835_v27  ;;  %3305 = vmatprep.subr.mxu0 %v3553_v1  ;;  %v2495_v27 = vld [vmem:[%s4379_s2 + $0x48] sm:$0xff] }
0x2d47   :  { %3306 = vmatpush3.msra.mxu0 %v2495_v27 }
0x2d48   :  { %3307 = vmatprep.subr.mxu0 %v3553_v1 }
0x2d53   :  { %v3516_v29 = vpop.eup %3515 }
0x2d54   :  { %v2325_v30 = vadd.f32 1.0, %v3516_v29  ;;  %v2797_v29 = vsel %vm1187_vm4, 1.0, %v3553_v1 }
0x2d56   :  { %3517 = vrcp.f32 %v2325_v30 }
0x2d63   :  { %v3518_v31 = vpop.eup %3517 }
0x2d64   :  { %v2328_v35 = vmul.f32 2.0, %v3518_v31  ;;  %v2330_v41 = vmul.f32 %v3518_v31, %v2224_v52 }
0x2d66   :  { %v2836_v36 = vadd.f32 -1.0, %v2328_v35 }
0x2d68   :  { %2332 = vrot.lane.b32.xlu0 %v2836_v36, %s3555_s4  ;;  %v2805_v36 = vsel %vm1419_vm6, 1.0, %v3553_v1 }
0x2dda   :  { %v2333_v7 = vpop.permute.xlu0 %2332 }
0x2ddb   :  { %v2335_v38 = vmul.f32 %v3518_v31, %v2333_v7  ;;  %v2837_v7 = vsel %vm2347_vm7, 1.0, %v3553_v1 }
0x2ddd   :  { %2337 = vrot.lane.b32.xlu1 %v2335_v38, %s3556_s5 }
0x2e4f   :  { %v2338_v42 = vpop.permute.xlu1 %2337 }
0x2e50   :  { %v4172_v43 = vadd.f32 %v2338_v42, %v2330_v41  ;;  %v3409_v42 = vpack.i.bf16 %v2837_v7, %v2805_v36 }
0x2e52   :  { %3519 = vtanh.f32 %v4172_v43 }
0x2e5f   :  { %v3520_v22 = vpop.eup %3519 }
0x2e60   :  { %2343 = vrot.lane.b32.xlu0 %v3520_v22, %s3555_s4 }
0x2ed2   :  { %v2344_v44 = vpop.permute.xlu0 %2343 }
0x2ed3   :  { %v4176_v45 = vmul.f32 %v3518_v31, %v2344_v44  ;;  %v2494_v31 = vld [vmem:[%s4379_s2 + $0x40] sm:$0xff] }
0x2ed4   :  { %3308 = vmatpush3.msra.mxu0 %v2494_v31 }
0x2ed5   :  { %2363 = vrot.lane.b32.xlu1 %v4176_v45, %s3556_s5 }
0x2f47   :  { %v2364_v46 = vpop.permute.xlu1 %2363 }
0x2f48   :  { %3299 = vmatmul.mubr.msk.f32.vlgmr.msra.gmra.mxu1 %vm21_vm1, %v2364_v46 }
0x2f49   :  { %3336 = vmatprep.mubr.msk.f32.mxu1 %vm3554_vm0, %v3553_v1  ;;  %3364 = vmatpush3.msra.mxu1 %v2497_v17 }
0x2f4a   :  { %3361 = vmatprep.subr.mxu1 %v3553_v1 }
0x2f4b   :  { %3365 = vmatpush3.msra.mxu1 %v2496_v23 }
0x2f4c   :  { %3362 = vmatprep.subr.mxu1 %v3553_v1 }
0x2f4d   :  { %3366 = vmatpush3.msra.mxu1 %v2495_v27 }
0x2f4e   :  { %3363 = vmatprep.subr.mxu1 %v3553_v1 }
0x2f4f   :  { %3367 = vmatpush3.msra.mxu1 %v2494_v31 }
0x3008   :  { %v2433_v47 = vpop.f32.mrf.mxu1 }
0x3009   :  { %v2437_v9 = vadd.f32 %v2433_v47, %v4081_v24  ;;  %v2777_v24 = vsel %vm607_vm5, 1.0, %v3553_v1  ;;  %vm2115_vm5 = vcmp.gt.s32.totalorder %v4189_v57, 13 }
0x300a   :  { %v3300_v51 = vpop.f32.mrf.mxu1  ;;  %v2829_v30 = vsel %vm2115_vm5, 1.0, %v3553_v1 }
0x300b   :  { %v2839_v53 = vmul.f32 -1.442695, %v2437_v9  ;;  %v3399_v35 = vpack.i.bf16 %v2829_v30, %v2797_v29 }
0x300d   :  { %3521 = vpow2.f32 %v2839_v53 }
0x301a   :  { %v3522_v54 = vpop.eup %3521 }
0x301b   :  { %v2441_v55 = vadd.f32 1.0, %v3522_v54 }
0x301d   :  { %3523 = vrcp.f32 %v2441_v55 }
0x302a   :  { %v4184_v56 = vpop.eup %3523 }
0x302b   :  { %v2444_v58 = vmul.f32 2.0, %v4184_v56  ;;  %v2446_v46 = vmul.f32 %v4184_v56, %v4172_v43 }
0x302d   :  { %v2840_v8 = vadd.f32 -1.0, %v2444_v58 }
0x302f   :  { %2448 = vrot.lane.b32.xlu0 %v2840_v8, %s3555_s4 }
0x3033   :  { %612 = vperm.xlu0 %3378, %v2777_v24  }
0x3037   :  { %3385 = vperm.xlu0 %3378, %v3384_v63  }
0x303b   :  { %3395 = vperm.xlu0 %3378, %v3394_v4  }
0x303f   :  { %3405 = vperm.xlu0 %3378, %v3404_v33  }
0x3043   :  { %3415 = vperm.xlu0 %3378, %v3414_v34  }
0x30a1   :  { %v2449_v13 = vpop.permute.xlu0 %2448 }
0x30a2   :  { %v2451_v52 = vmul.f32 %v4184_v56, %v2449_v13 }
0x30a4   :  { %2453 = vrot.lane.b32.xlu1 %v2451_v52, %s3556_s5 }
0x30a8   :  { %3380 = vperm.xlu1 %3377, %v3379_v20  }
0x30ac   :  { %3390 = vperm.xlu1 %3377, %v3389_v26  }
0x30ae   :  { %v613_v38 = vpop.permute.xlu0 %612 }
0x30af   :  { %v615_v41 = vmul.f32 %v613_v38, %v3768_v15 }
0x30b0   :  { %3400 = vperm.xlu1 %3377, %v3399_v35  }
0x30b1   :  { %617 = vrot.lane.b32.xlu0 %v615_v41, %s3556_s5 }
0x30b2   :  { %v3386_v22 = vpop.permute.xlu0 %3385 }
0x30b3   :  { %v3388_v8 = vunpack.i.h.bf16 %v3386_v22  ;;  %v3387_v43 = vunpack.i.l.bf16 %v3386_v22 }
0x30b4   :  { %3410 = vperm.xlu1 %3377, %v3409_v42  }
0x30b5   :  { %v1775_v63 = vmul.f32 %v3388_v8, %v4087_v49 }
0x30b6   :  { %v3396_v44 = vpop.permute.xlu0 %3395 }
0x30b7   :  { %v3398_v5 = vunpack.i.h.bf16 %v3396_v44  ;;  %v3397_v49 = vunpack.i.l.bf16 %v3396_v44 }
0x30b9   :  { %v2007_v11 = vmul.f32 %v3398_v5, %v4124_v40 }
0x30ba   :  { %v3406_v51 = vpop.permute.xlu0 %3405 }
0x30bb   :  { %v3408_v13 = vunpack.i.h.bf16 %v3406_v51  ;;  %v3407_v16 = vunpack.i.l.bf16 %v3406_v51 }
0x30bd   :  { %v2239_v40 = vmul.f32 %v3408_v13, %v4162_v18 }
0x30be   :  { %v4251_v53 = vpop.permute.xlu0 %3415 }
0x30bf   :  { %v3417_v17 = vunpack.i.l.bf16 %v4251_v53 }
0x30c1   :  { %v1543_v18 = vmul.f32 %v3417_v17, %v3968_v28 }
0x3116   :  { %v2454_v47 = vpop.permute.xlu1 %2453 }
0x3117   :  { %v2456_v9 = vadd.f32 %v2454_v47, %v2446_v46 }
0x3119   :  { %3525 = vtanh.f32 %v2456_v9 }
0x3123   :  { %v3381_v54 = vpop.permute.xlu1 %3380  ;;  %v618_v55 = vpop.permute.xlu0 %617 }
0x3124   :  { %v3383_v57 = vunpack.i.h.bf16 %v3381_v54  ;;  %620 = vst.msk [vmem:[#allocation3] sm:$0xff] %vm21_vm1, %v618_v55  ;;  %v3382_v15 = vunpack.i.l.bf16 %v3381_v54 }
0x3126   :  { %v3526_v58 = vpop.eup %3525  ;;  %v1659_v24 = vmul.f32 %v3383_v57, %v4029_v0  ;;  %v731_v62 = vmul.f32 %v3382_v15, %v3793_v37  ;;  %v847_v0 = vmul.f32 %v3387_v43, %v3818_v61  ;;  %v1079_v61 = vmul.f32 %v3397_v49, %v3868_v48  ;;  %v4353_v43 = vld [vmem:[%s4379_s2 + $0x68] ss:$0 sm:$0xff]  ;;  %s3559_s2 = smov [#allocation4]  }
0x3127   :  { %2459 = vrot.lane.b32.xlu1 %v3526_v58, %s3555_s4  ;;  %v3391_v59 = vpop.permute.xlu1 %3390  ;;  %v1311_v48 = vmul.f32 %v3407_v16, %v3918_v39  ;;  %v3418_v39 = vunpack.i.h.bf16 %v4251_v53  ;;  %s2726_s11 = sshll.u32 %s3559_s2, 4  ;;  %s2727_s11 = int_to_ptr.vmem [resolvable:$true] %s2726_s11 }
0x3128   :  { %1661 = vrot.lane.b32.xlu0 %v1659_v24, %s3556_s5  ;;  %v3393_v32 = vunpack.i.h.bf16 %v3391_v59  ;;  %v3392_v4 = vunpack.i.l.bf16 %v3391_v59  ;;  %s3531_s12 = scalar_lea.vmem %s2727_s11, 2176  ;;  %p3536_p1 = scmp.lt.s32.totalorder %s2727_s11, %s2727_s11 }
0x3129   :  { %p3532_p0 = scmp.ne.s32.totalorder %s2727_s11, %s3531_s12  ;;  %p3537_p2 = scmp.lt.s32.totalorder %s3531_s12, %s3531_s12 }
0x312a   :  { %v1891_v10 = vmul.f32 %v3393_v32, %v4105_v12  ;;  %v963_v33 = vmul.f32 %v3392_v4, %v3843_v25 }
0x312b   :  { %733 = vrot.lane.b32.xlu1 %v731_v62, %s3556_s5  ;;  %v2477_v3 = vld [vmem:[#allocation3] sm:$0xff]  ;;  %v3401_v37 = vpop.permute.xlu1 %3400  ;;  %p3538_p3 = por %p3537_p2, %p3536_p1 }
0x312c   :  { %3310 = vmatmul.mubr.msk.f32.vlgmr.msra.gmra.mxu0 %vm21_vm1, %v2477_v3  ;;  %1777 = vrot.lane.b32.xlu0 %v1775_v63, %s3556_s5  ;;  %v3403_v6 = vunpack.i.h.bf16 %v3401_v37  ;;  %v3402_v34 = vunpack.i.l.bf16 %v3401_v37 }
0x312d   :  { %3312 = vmatprep.mubr.msk.f32.mxu0 %vm3554_vm0, %v3553_v1  ;;  %p3539_p4 = pnand %p3538_p3, %p3532_p0 }
0x312e   :  { %v2123_v12 = vmul.f32 %v3403_v6, %v4143_v60  ;;  %v1195_v25 = vmul.f32 %v3402_v34, %v3893_v14 }
0x312f   :  { %849 = vrot.lane.b32.xlu1 %v847_v0, %s3556_s5  ;;  %v3411_v50 = vpop.permute.xlu1 %3410 }
0x3130   :  { %1893 = vrot.lane.b32.xlu0 %v1891_v10, %s3556_s5  ;;  %v3413_v52 = vunpack.i.h.bf16 %v3411_v50  ;;  %v3412_v20 = vunpack.i.l.bf16 %v3411_v50 }
0x3132   :  { %v2355_v60 = vmul.f32 %v3413_v52, %v4176_v45  ;;  %v1427_v14 = vmul.f32 %v3412_v20, %v3943_v2 }
0x3133   :  { %965 = vrot.lane.b32.xlu1 %v963_v33, %s3556_s5 }
0x3134   :  { %2009 = vrot.lane.b32.xlu0 %v2007_v11, %s3556_s5 }
0x3137   :  { %1081 = vrot.lane.b32.xlu1 %v1079_v61, %s3556_s5 }
0x3138   :  { %2125 = vrot.lane.b32.xlu0 %v2123_v12, %s3556_s5 }
0x313b   :  { %1197 = vrot.lane.b32.xlu1 %v1195_v25, %s3556_s5 }
0x313c   :  { %2241 = vrot.lane.b32.xlu0 %v2239_v40, %s3556_s5 }
0x313f   :  { %1313 = vrot.lane.b32.xlu1 %v1311_v48, %s3556_s5 }
0x3140   :  { %2357 = vrot.lane.b32.xlu0 %v2355_v60, %s3556_s5 }
0x3143   :  { %1429 = vrot.lane.b32.xlu1 %v1427_v14, %s3556_s5 }
0x3147   :  { %1545 = vrot.lane.b32.xlu1 %v1543_v18, %s3556_s5 }
0x3199   :  { %v2460_v19 = vpop.permute.xlu1 %2459 }
0x319a   :  { %v2462_v21 = vmul.f32 %v4184_v56, %v2460_v19  ;;  %v1662_v45 = vpop.permute.xlu0 %1661 }
0x319b   :  { %1664 = vst.msk [vmem:[#allocation3 + $0x48] sm:$0xff] %vm21_vm1, %v1662_v45 }
0x319c   :  { %v2471_v23 = vmul.f32 %v3418_v39, %v2462_v21 }
0x319d   :  { %v734_v26 = vpop.permute.xlu1 %733 }
0x319e   :  { %736 = vst.msk [vmem:[#allocation3 + $0x8] sm:$0xff] %vm21_vm1, %v734_v26  ;;  %2473 = vrot.lane.b32.xlu0 %v2471_v23, %s3556_s5  ;;  %v1778_v2 = vpop.permute.xlu0 %1777 }
0x319f   :  { %1780 = vst.msk [vmem:[#allocation3 + $0x50] sm:$0xff] %vm21_vm1, %v1778_v2 }
0x31a1   :  { %v850_v28 = vpop.permute.xlu1 %849 }
0x31a2   :  { %852 = vst.msk [vmem:[#allocation3 + $0x10] sm:$0xff] %vm21_vm1, %v850_v28  ;;  %v1894_v27 = vpop.permute.xlu0 %1893  ;;  %v2486_v29 = vld [vmem:[#allocation3 + $0x48] sm:$0xff] }
0x31a3   :  { %1896 = vst.msk [vmem:[#allocation3 + $0x58] sm:$0xff] %vm21_vm1, %v1894_v27  ;;  %3337 = vmatmul.mubr.msk.f32.vlgmr.msra.gmra.mxu1 %vm21_vm1, %v2486_v29 }
0x31a4   :  { %3339 = vmatprep.mubr.msk.f32.mxu1 %vm3554_vm0, %v3553_v1 }
0x31a5   :  { %v966_v56 = vpop.permute.xlu1 %965  ;;  %v2478_v30 = vld [vmem:[#allocation3 + $0x8] sm:$0xff] }
0x31a6   :  { %968 = vst.msk [vmem:[#allocation3 + $0x18] sm:$0xff] %vm21_vm1, %v966_v56  ;;  %3313 = vmatmul.mubr.msk.f32.gmra.mxu0 %vm21_vm1, %v2478_v30  ;;  %v2010_v31 = vpop.permute.xlu0 %2009  ;;  %v2487_v35 = vld [vmem:[#allocation3 + $0x50] sm:$0xff] }
0x31a7   :  { %2012 = vst.msk [vmem:[#allocation3 + $0x60] sm:$0xff] %vm21_vm1, %v2010_v31  ;;  %3340 = vmatmul.mubr.msk.f32.gmra.mxu1 %vm21_vm1, %v2487_v35  ;;  %3315 = vmatprep.mubr.msk.f32.mxu0 %vm3554_vm0, %v3553_v1 }
0x31a8   :  { %3342 = vmatprep.mubr.msk.f32.mxu1 %vm3554_vm0, %v3553_v1 }
0x31a9   :  { %v1082_v36 = vpop.permute.xlu1 %1081  ;;  %v2479_v7 = vld [vmem:[#allocation3 + $0x10] sm:$0xff] }
0x31aa   :  { %1084 = vst.msk [vmem:[#allocation3 + $0x20] sm:$0xff] %vm21_vm1, %v1082_v36  ;;  %v2126_v38 = vpop.permute.xlu0 %2125  ;;  %3316 = vmatmul.mubr.msk.f32.gmra.mxu0 %vm21_vm1, %v2479_v7  ;;  %v2488_v41 = vld [vmem:[#allocation3 + $0x58] sm:$0xff] }
0x31ab   :  { %2128 = vst.msk [vmem:[#allocation3 + $0x68] sm:$0xff] %vm21_vm1, %v2126_v38  ;;  %3343 = vmatmul.mubr.msk.f32.gmra.mxu1 %vm21_vm1, %v2488_v41  ;;  %3318 = vmatprep.mubr.msk.f32.mxu0 %vm3554_vm0, %v3553_v1 }
0x31ac   :  { %3345 = vmatprep.mubr.msk.f32.mxu1 %vm3554_vm0, %v3553_v1 }
0x31ad   :  { %v1198_v42 = vpop.permute.xlu1 %1197  ;;  %v2480_v22 = vld [vmem:[#allocation3 + $0x18] sm:$0xff] }
0x31ae   :  { %1200 = vst.msk [vmem:[#allocation3 + $0x28] sm:$0xff] %vm21_vm1, %v1198_v42  ;;  %v2242_v44 = vpop.permute.xlu0 %2241  ;;  %3319 = vmatmul.mubr.msk.f32.gmra.mxu0 %vm21_vm1, %v2480_v22  ;;  %v2489_v46 = vld [vmem:[#allocation3 + $0x60] sm:$0xff] }
0x31af   :  { %2244 = vst.msk [vmem:[#allocation3 + $0x70] sm:$0xff] %vm21_vm1, %v2242_v44  ;;  %3346 = vmatmul.mubr.msk.f32.gmra.mxu1 %vm21_vm1, %v2489_v46  ;;  %3321 = vmatprep.mubr.msk.f32.mxu0 %vm3554_vm0, %v3553_v1 }
0x31b0   :  { %3348 = vmatprep.mubr.msk.f32.mxu1 %vm3554_vm0, %v3553_v1 }
0x31b1   :  { %v1314_v47 = vpop.permute.xlu1 %1313  ;;  %v2481_v9 = vld [vmem:[#allocation3 + $0x20] sm:$0xff] }
0x31b2   :  { %1316 = vst.msk [vmem:[#allocation3 + $0x30] sm:$0xff] %vm21_vm1, %v1314_v47  ;;  %v2358_v51 = vpop.permute.xlu0 %2357  ;;  %3322 = vmatmul.mubr.msk.f32.gmra.mxu0 %vm21_vm1, %v2481_v9  ;;  %v2490_v53 = vld [vmem:[#allocation3 + $0x68] sm:$0xff] }
0x31b3   :  { %2360 = vst.msk [vmem:[#allocation3 + $0x78] sm:$0xff] %vm21_vm1, %v2358_v51  ;;  %3349 = vmatmul.mubr.msk.f32.gmra.mxu1 %vm21_vm1, %v2490_v53  ;;  %3324 = vmatprep.mubr.msk.f32.mxu0 %vm3554_vm0, %v3553_v1 }
0x31b4   :  { %3351 = vmatprep.mubr.msk.f32.mxu1 %vm3554_vm0, %v3553_v1 }
0x31b5   :  { %v1430_v54 = vpop.permute.xlu1 %1429  ;;  %v2482_v55 = vld [vmem:[#allocation3 + $0x28] sm:$0xff] }
0x31b6   :  { %1432 = vst.msk [vmem:[#allocation3 + $0x38] sm:$0xff] %vm21_vm1, %v1430_v54  ;;  %3325 = vmatmul.mubr.msk.f32.gmra.mxu0 %vm21_vm1, %v2482_v55  ;;  %v2491_v57 = vld [vmem:[#allocation3 + $0x70] sm:$0xff] }
0x31b7   :  { %3352 = vmatmul.mubr.msk.f32.gmra.mxu1 %vm21_vm1, %v2491_v57  ;;  %3327 = vmatprep.mubr.msk.f32.mxu0 %vm3554_vm0, %v3553_v1 }
0x31b8   :  { %3354 = vmatprep.mubr.msk.f32.mxu1 %vm3554_vm0, %v3553_v1 }
0x31b9   :  { %v1546_v15 = vpop.permute.xlu1 %1545  ;;  %v2483_v58 = vld [vmem:[#allocation3 + $0x30] sm:$0xff] }
0x31ba   :  { %1548 = vst.msk [vmem:[#allocation3 + $0x40] sm:$0xff] %vm21_vm1, %v1546_v15  ;;  %3328 = vmatmul.mubr.msk.f32.gmra.mxu0 %vm21_vm1, %v2483_v58  ;;  %v2492_v8 = vld [vmem:[#allocation3 + $0x78] sm:$0xff] }
0x31bb   :  { %3355 = vmatmul.mubr.msk.f32.gmra.mxu1 %vm21_vm1, %v2492_v8  ;;  %3330 = vmatprep.mubr.msk.f32.mxu0 %vm3554_vm0, %v3553_v1 }
0x31bc   :  { %3357 = vmatprep.mubr.msk.f32.mxu1 %vm3554_vm0, %v3553_v1 }
0x31bd   :  { %v2484_v24 = vld [vmem:[#allocation3 + $0x38] sm:$0xff] }
0x31be   :  { %3331 = vmatmul.mubr.msk.f32.gmra.mxu0 %vm21_vm1, %v2484_v24 }
0x31bf   :  { %3333 = vmatprep.mubr.msk.f32.mxu0 %vm3554_vm0, %v3553_v1 }
0x31c1   :  { %v2485_v59 = vld [vmem:[#allocation3 + $0x40] sm:$0xff] }
0x31c2   :  { %3334 = vmatmul.mubr.msk.f32.gmra.mxu0 %vm21_vm1, %v2485_v59 }
0x31ec   :  { %v2620_v62 = vpop.f32.mrf.mxu0 }
0x31ed   :  { %v2621_v63 = vadd.f32 %v4353_v43, %v2620_v62 }
0x31ee   :  { %v3311_v32 = vpop.f32.mrf.mxu0 }
0x31ef   :  { %2704 = vst [vmem:[#allocation4] sm:$0xff] %v2621_v63 }
0x3210   :  { %v2474_v3 = vpop.permute.xlu0 %2473 }
0x3211   :  { %2476 = vst.msk [vmem:[#allocation3 + $0x80] sm:$0xff] %vm21_vm1, %v2474_v3 }
0x3218   :  { %v2493_v0 = vld [vmem:[#allocation3 + $0x80] sm:$0xff] }
0x3219   :  { %3358 = vmatmul.mubr.msk.f32.gmra.mxu1 %vm21_vm1, %v2493_v0 }
0x3263   :  { %v2665_v1 = vpop.f32.mrf.mxu1 }
0x3264   :  { %v2666_v4 = vadd.f32 %v4353_v43, %v2665_v1 }
0x3265   :  { %v3338_v5 = vpop.f32.mrf.mxu1 }
0x3266   :  { %2713 = vst [vmem:[#allocation4 + $0x48] sm:$0xff] %v2666_v4  ;;  %v2625_v10 = vpop.f32.mrf.mxu0 }
0x3267   :  { %v2626_v37 = vadd.f32 %v4353_v43, %v2625_v10  ;;  %v2670_v49 = vpop.f32.mrf.mxu1 }
0x3268   :  { %v2671_v33 = vadd.f32 %v4353_v43, %v2670_v49  ;;  %v3314_v11 = vpop.f32.mrf.mxu0 }
0x3269   :  { %2705 = vst [vmem:[#allocation4 + $0x8] sm:$0xff] %v2626_v37  ;;  %v3341_v6 = vpop.f32.mrf.mxu1 }
0x326a   :  { %2714 = vst [vmem:[#allocation4 + $0x50] sm:$0xff] %v2671_v33  ;;  %v2630_v61 = vpop.f32.mrf.mxu0 }
0x326b   :  { %v2631_v34 = vadd.f32 %v4353_v43, %v2630_v61  ;;  %v2675_v13 = vpop.f32.mrf.mxu1 }
0x326c   :  { %v2676_v12 = vadd.f32 %v4353_v43, %v2675_v13  ;;  %v3317_v50 = vpop.f32.mrf.mxu0 }
0x326d   :  { %2706 = vst [vmem:[#allocation4 + $0x10] sm:$0xff] %v2631_v34  ;;  %v3344_v16 = vpop.f32.mrf.mxu1 }
0x326e   :  { %2715 = vst [vmem:[#allocation4 + $0x58] sm:$0xff] %v2676_v12  ;;  %v2635_v25 = vpop.f32.mrf.mxu0 }
0x326f   :  { %v2636_v40 = vadd.f32 %v4353_v43, %v2635_v25  ;;  %v2680_v52 = vpop.f32.mrf.mxu1 }
0x3270   :  { %v2681_v48 = vadd.f32 %v4353_v43, %v2680_v52  ;;  %v3320_v20 = vpop.f32.mrf.mxu0 }
0x3271   :  { %2707 = vst [vmem:[#allocation4 + $0x18] sm:$0xff] %v2636_v40  ;;  %v3347_v60 = vpop.f32.mrf.mxu1 }
0x3272   :  { %2716 = vst [vmem:[#allocation4 + $0x60] sm:$0xff] %v2681_v48  ;;  %v2640_v17 = vpop.f32.mrf.mxu0 }
0x3273   :  { %v2641_v14 = vadd.f32 %v4353_v43, %v2640_v17  ;;  %v2685_v18 = vpop.f32.mrf.mxu1 }
0x3274   :  { %v2686_v19 = vadd.f32 %v4353_v43, %v2685_v18  ;;  %v3323_v39 = vpop.f32.mrf.mxu0 }
0x3275   :  { %2708 = vst [vmem:[#allocation4 + $0x20] sm:$0xff] %v2641_v14  ;;  %v3350_v21 = vpop.f32.mrf.mxu1 }
0x3276   :  { %2717 = vst [vmem:[#allocation4 + $0x68] sm:$0xff] %v2686_v19  ;;  %v2645_v45 = vpop.f32.mrf.mxu0 }
0x3277   :  { %v2646_v23 = vadd.f32 %v4353_v43, %v2645_v45  ;;  %v2690_v26 = vpop.f32.mrf.mxu1 }
0x3278   :  { %v2691_v2 = vadd.f32 %v4353_v43, %v2690_v26  ;;  %v3326_v28 = vpop.f32.mrf.mxu0 }
0x3279   :  { %2709 = vst [vmem:[#allocation4 + $0x28] sm:$0xff] %v2646_v23  ;;  %v3353_v27 = vpop.f32.mrf.mxu1 }
0x327a   :  { %2718 = vst [vmem:[#allocation4 + $0x70] sm:$0xff] %v2691_v2  ;;  %v2650_v29 = vpop.f32.mrf.mxu0 }
0x327b   :  { %v2651_v56 = vadd.f32 %v4353_v43, %v2650_v29  ;;  %v2695_v30 = vpop.f32.mrf.mxu1 }
0x327c   :  { %v2696_v31 = vadd.f32 %v4353_v43, %v2695_v30  ;;  %v3329_v35 = vpop.f32.mrf.mxu0 }
0x327d   :  { %2710 = vst [vmem:[#allocation4 + $0x30] sm:$0xff] %v2651_v56  ;;  %v3356_v36 = vpop.f32.mrf.mxu1 }
0x327e   :  { %2719 = vst [vmem:[#allocation4 + $0x78] sm:$0xff] %v2696_v31  ;;  %v2655_v7 = vpop.f32.mrf.mxu0 }
0x327f   :  { %v2656_v38 = vadd.f32 %v4353_v43, %v2655_v7 }
0x3280   :  { %v3332_v41 = vpop.f32.mrf.mxu0 }
0x3281   :  { %2711 = vst [vmem:[#allocation4 + $0x38] sm:$0xff] %v2656_v38 }
0x3282   :  { %v2660_v42 = vpop.f32.mrf.mxu0 }
0x3283   :  { %v2661_v22 = vadd.f32 %v4353_v43, %v2660_v42 }
0x3284   :  { %v3335_v44 = vpop.f32.mrf.mxu0 }
0x3285   :  { %2712 = vst [vmem:[#allocation4 + $0x40] sm:$0xff] %v2661_v22 }
0x32d9   :  { %v2700_v46 = vpop.f32.mrf.mxu1 }
0x32da   :  { %v2701_v47 = vadd.f32 %v4353_v43, %v2700_v46 }
0x32db   :  { %v3359_v9 = vpop.f32.mrf.mxu1 }
0x32dc   :  { %2720 = vst [vmem:[#allocation4 + $0x80] sm:$0xff] %v2701_v47 }
0x32dd   :  { %3542 = shalt.err (!%p3539_p4)
}
0x32de   :  { %s3560_s13 = smov 128   ;;  %s3561_s14 = smov 8  }
0x32df   :  { %2732 = dma.vmem_to_hbm [thread:$0]  %s2727_s11, 2176, %s4380_s3, [#allocation5], %s3560_s13, %s3560_s13, %s3561_s14  }
0x32e0   :  { %3551 = dma.done.wait [#allocation5], 2176  }
0x32e1   :  { %3552 = vsyncadd [#allocation5], 4294965120 }
0x32e2   :  { %2736 = vsyncpa [#allocation5], 1 }

</bundles_post_ra>
